<compile_context>
chip_gen: v7x
topology: tpu7x:2x2x1
jax: 0.10.0
libtpu: 0.0.40
codegen_flags: <defaults>
</compile_context>

<pallas_src>
import numpy as np
import jax
import jax.numpy as jnp
from jax.experimental import pallas as pl
from jax.experimental.pallas import tpu as pltpu


# ---------------------------------------------------------------------------
# Fused forward-pass kernel
# ---------------------------------------------------------------------------
def _make_fused_kernel(Bblk, H, W, K, n_res):
  pad = (K - 1) // 2
  R = Bblk * H            # rows per grid step: (batch-in-block, height) folded

  def kernel(*refs):
    it = iter(refs)
    x_ref = next(it)
    t0, b0 = next(it), next(it)
    res = [(next(it), next(it), next(it), next(it)) for _ in range(n_res)]
    ta, ab = next(it), next(it)
    cw, cb = next(it), next(it)
    actor_ref, critic_ref = next(it), next(it)

    # Image-boundary masks for vertical taps.  Only needed when several images
    # are folded into the row axis (a shift must not leak rows across images);
    # for Bblk == 1 the zero fill at the array edges already handles padding.
    masks = {}
    if Bblk > 1:
      row = jax.lax.broadcasted_iota(jnp.int32, (R, 1), 0)
      hh = row % H
      for kh in range(K):
        dh = kh - pad
        if dh != 0:
          masks[dh] = jnp.logical_and(hh + dh >= 0, hh + dh < H)

    def shifted(x, dh):
      # s[r, :] = x[r + dh, :] if row r+dh lies in the same image, else 0.
      if dh == 0:
        return x
      ncols = x.shape[1]
      zfill = jnp.zeros((abs(dh), ncols), jnp.float32)
      if dh > 0:
        y = jnp.concatenate([x[dh:, :], zfill], axis=0)
      else:
        y = jnp.concatenate([zfill, x[:R + dh, :]], axis=0)
      if Bblk > 1:
        y = jnp.where(masks[dh], y, 0.0)
      return y

    def conv(x, t_ref, b_ref):
      # One deep matmul: lane-concat the K row-shifted slabs (im2col along kh),
      # kw taps + horizontal 'same' padding live inside the Toeplitz weights.
      slabs = [shifted(x, kh - pad) for kh in range(K)]
      s_all = slabs[0] if len(slabs) == 1 else jnp.concatenate(slabs, axis=1)
      return jnp.dot(s_all, t_ref[...],
                     preferred_element_type=jnp.float32) + b_ref[...]

    # Torso layer 0: conv + ReLU.
    x = x_ref[...]                                        # (R, W*Cin)
    h = jnp.maximum(conv(x, t0, b0), 0.0)                 # (R, W*nh)

    # Residual blocks: h = relu(h + conv2(relu(conv1(h)))).
    for (t1, b1, t2, b2) in res:
      y = jnp.maximum(conv(h, t1, b1), 0.0)
      h = jnp.maximum(h + conv(y, t2, b2), 0.0)

    # Actor head: 3x3 conv with Cout = 1  ->  (R, W) rows of the output image.
    actor_ref[...] = conv(h, ta, ab)

    # Critic head: Linear over the flattened torso output.  The NCHW-flatten
    # permutation is baked into cw (pre-tiled to (R, W*nh) in the wrapper), so
    # this is a pure multiply-reduce epilogue.
    prod = h * cw[...]                                    # (R, W*nh)
    row_sums = jnp.sum(prod, axis=1, keepdims=True)       # (R, 1)
    parts = [jnp.sum(row_sums[b * H:(b + 1) * H, :], axis=0, keepdims=True)
             for b in range(Bblk)]                        # Bblk x (1, 1)
    crit = parts[0] if Bblk == 1 else jnp.concatenate(parts, axis=1)
    critic_ref[...] = crit + cb[...]                      # (1, Bblk)

  return kernel


# ---------------------------------------------------------------------------
# Generation-aware batch blocking
# ---------------------------------------------------------------------------
def _num_tensorcores_per_chip():
  try:
    kind = jax.devices()[0].device_kind.lower()
  except Exception:   # pragma: no cover
    return 1
  return 2 if "v7" in kind else 1     # v5e/v6e: 1 TC per chip, v7x: 2


def _pick_batch_block(B, H, W, n_cores, max_pixels=4096):
  """Maximize rows per grid step; keep >= n_cores blocks only on multi-TC chips."""
  divs = [d for d in range(1, B + 1) if B % d == 0]
  allowed = [d for d in divs if B // d >= n_cores]
  if not allowed:
    allowed = [1]
  fitting = [d for d in allowed if d * H * W <= max_pixels]
  return max(fitting) if fitting else min(allowed)


# ---------------------------------------------------------------------------
# Wrapper around pallas_call
# ---------------------------------------------------------------------------
def auction_convnet_forward(params, x_nchw):
  B, C, H, W = x_nchw.shape
  K = params['t0'].shape[0] // (W * C)
  n_res = len(params['res_layers'])

  n_cores = _num_tensorcores_per_chip()
  Bblk = _pick_batch_block(B, H, W, n_cores)
  G = B // Bblk
  R = Bblk * H

  # One tiny layout change of the raw observation: NCHW -> packed (B*H, W*C).
  x_p = jnp.transpose(x_nchw, (0, 2, 3, 1)).reshape(B * H, W * C)
  # Critic weights tiled per batch element in the block (rows match h's rows).
  cw_tiled = jnp.tile(params['cw'], (Bblk, 1))

  in_arrays = [x_p, params['t0'], params['b0']]
  for res in params['res_layers']:
    in_arrays += [res['t1'], res['b1'], res['t2'], res['b2']]
  in_arrays += [params['ta'], params['ab'], cw_tiled, params['cb']]

  def const_spec(arr):
    nd = arr.ndim
    return pl.BlockSpec(arr.shape, lambda i, _nd=nd: (0,) * _nd)

  in_specs = [pl.BlockSpec((R, W * C), lambda i: (i, 0))]
  in_specs += [const_spec(a) for a in in_arrays[1:]]

  out_shape = (jax.ShapeDtypeStruct((B * H, W), jnp.float32),   # actor rows
               jax.ShapeDtypeStruct((G, Bblk), jnp.float32))    # critic
  out_specs = (pl.BlockSpec((R, W), lambda i: (i, 0)),
               pl.BlockSpec((1, Bblk), lambda i: (i, 0)))

  kernel = _make_fused_kernel(Bblk, H, W, K, n_res)

  actor2d, critic2d = pl.pallas_call(
      kernel,
      out_shape=out_shape,
      grid=(G,),
      in_specs=in_specs,
      out_specs=out_specs,
      compiler_params=pltpu.CompilerParams(
          dimension_semantics=("parallel",)),
  )(*in_arrays)

  actor = actor2d.reshape(B, 1, H, W)
  critic = critic2d.reshape(B, 1)
  return actor, critic


# ---------------------------------------------------------------------------
# Parameter init (matches PyTorch __init__: orthogonal weights, zero biases).
# Packed/Toeplitz layouts for the kernel are built here once; the raw HWIO
# weights are also returned so a pure-JAX reference can verify the kernel.
# ---------------------------------------------------------------------------
def _toeplitz(w_hwio, W):
  """(K, K, Cin, Cout) conv weight -> (K*W*Cin, W*Cout) block-Toeplitz matrix
  implementing the kw taps (with 'same' horizontal padding) of the packed layout."""
  w = np.asarray(w_hwio, np.float32)
  K, _, Cin, Cout = w.shape
  pad = (K - 1) // 2
  T = np.zeros((K, W * Cin, W * Cout), np.float32)
  for kh in range(K):
    for wo in range(W):
      for kw in range(K):
        wi = wo + kw - pad
        if 0 <= wi < W:
          T[kh, wi * Cin:(wi + 1) * Cin, wo * Cout:(wo + 1) * Cout] = w[kh, kw]
  return jnp.asarray(T.reshape(K * W * Cin, W * Cout))


def _pack_bias(b_vec, W):
  """(Cout,) -> (1, W*Cout), repeated per spatial column."""
  b = jnp.asarray(b_vec, jnp.float32).reshape(1, -1)
  return jnp.tile(b, (1, W))


def init_params(key, observation_shape, hidden_sizes, kernel_size=3,
                actor_std=0.01, critic_std=1.0):
  assert np.allclose(hidden_sizes, hidden_sizes[0]), "All hidden sizes must be equal"
  C = int(observation_shape[0])
  spatial = tuple(int(s) for s in observation_shape[1:])
  assert len(spatial) == 2, "num_products == 2 (Conv2d) path only"
  # TODO(synk): Conv3d path (num_products == 3) not implemented.
  H, W = spatial
  nh = int(hidden_sizes[0])
  K = kernel_size
  n_res = len(hidden_sizes) - 1

  keys = iter(jax.random.split(key, 3 + 2 * n_res))

  def conv_w(k, cin, cout, std):
    # PyTorch orthogonal_ treats the conv weight as (cout, cin*K*K);
    # convert to HWIO (K, K, Cin, Cout).
    w2d = jax.nn.initializers.orthogonal(scale=std)(k, (cout, cin * K * K),
                                                    jnp.float32)
    w = w2d.reshape(cout, cin, K, K)
    return jnp.transpose(w, (2, 3, 1, 0))

  params, raw = {}, {}

  w0 = conv_w(next(keys), C, nh, 1.0)
  b0 = jnp.zeros((nh,), jnp.float32)
  raw['torso0_w'], raw['torso0_b'] = w0, b0
  params['t0'], params['b0'] = _toeplitz(w0, W), _pack_bias(b0, W)

  params['res_layers'], raw['res_layers'] = [], []
  for _ in range(n_res):
    w1 = conv_w(next(keys), nh, nh, 1.0); b1 = jnp.zeros((nh,), jnp.float32)
    w2 = conv_w(next(keys), nh, nh, 1.0); b2 = jnp.zeros((nh,), jnp.float32)
    raw['res_layers'].append({'w1': w1, 'b1': b1, 'w2': w2, 'b2': b2})
    params['res_layers'].append({'t1': _toeplitz(w1, W), 'b1': _pack_bias(b1, W),
                                 't2': _toeplitz(w2, W), 'b2': _pack_bias(b2, W)})

  wa = conv_w(next(keys), nh, 1, actor_std)
  ba = jnp.zeros((1,), jnp.float32)
  raw['actor_w'], raw['actor_b'] = wa, ba
  params['ta'], params['ab'] = _toeplitz(wa, W), _pack_bias(ba, W)   # (K*W*nh, W), (1, W)

  # Critic Linear weight (1, nh*H*W).  PyTorch flattens the torso output in NCHW
  # order (index = c*H*W + h*W + w); bake that permutation into the packed
  # (H, W*nh) layout matching the kernel's row/lane activation layout.
  F = nh * H * W
  wlin = jax.nn.initializers.orthogonal(scale=critic_std)(next(keys), (1, F),
                                                          jnp.float32)
  blin = jnp.zeros((1,), jnp.float32)
  raw['critic_w'], raw['critic_b'] = wlin, blin
  params['cw'] = jnp.transpose(wlin.reshape(nh, H, W), (1, 2, 0)).reshape(H, W * nh)
  params['cb'] = blin.reshape(1, 1)
  return params, raw


# ---------------------------------------------------------------------------
# Pure-JAX reference of the same module (uses the raw HWIO weights).
# ---------------------------------------------------------------------------
def _reference_forward(raw, x_nchw):
  xh = jnp.transpose(x_nchw, (0, 2, 3, 1))

  def conv(x, w, b):
    y = jax.lax.conv_general_dilated(
        x, w, window_strides=(1, 1), padding="SAME",
        dimension_numbers=("NHWC", "HWIO", "NHWC"),
        precision=jax.lax.Precision.HIGHEST)
    return y + b.reshape(1, 1, 1, -1)

  h = jax.nn.relu(conv(xh, raw['torso0_w'], raw['torso0_b']))
  for r in raw['res_layers']:
    y = jax.nn.relu(conv(h, r['w1'], r['b1']))
    h = jax.nn.relu(h + conv(y, r['w2'], r['b2']))
  actor = jnp.transpose(conv(h, raw['actor_w'], raw['actor_b']), (0, 3, 1, 2))
  hc = jnp.transpose(h, (0, 3, 1, 2)).reshape(h.shape[0], -1)       # NCHW flatten
  critic = (jnp.sum(hc * raw['critic_w'], axis=-1, keepdims=True)
            + raw['critic_b'].reshape(1, 1))
  return actor, critic


# ---------------------------------------------------------------------------
if __name__ == "__main__":
  key = jax.random.PRNGKey(0)
  k_param, k_x = jax.random.split(key)

  B, C, H, W = 2, 4, 8, 8
  observation_shape = (C, H, W)
  hidden_sizes = [32, 32]            # first conv + 1 residual block

  params, raw = init_params(k_param, observation_shape, hidden_sizes,
                            kernel_size=3, actor_std=0.01, critic_std=1.0)
  x = jax.random.normal(k_x, (B, C, H, W), jnp.float32)

  fwd = jax.jit(auction_convnet_forward)
  actor_out, critic_out = fwd(params, x)
  jax.block_until_ready((actor_out, critic_out))

  ref_actor, ref_critic = _reference_forward(raw, x)

  assert actor_out.shape == (B, 1, H, W), actor_out.shape
  assert critic_out.shape == (B, 1), critic_out.shape
  assert actor_out.dtype == jnp.float32 and critic_out.dtype == jnp.float32
  assert bool(jnp.all(jnp.isfinite(actor_out)))
  assert bool(jnp.all(jnp.isfinite(critic_out)))
  assert bool(jnp.allclose(actor_out, ref_actor, atol=1e-4, rtol=1e-4))
  assert bool(jnp.allclose(critic_out, ref_critic, atol=1e-3, rtol=1e-4))

  print("KERNEL_OK")
</pallas_src>

<mosaic_0001>
module attributes {stable_mosaic.version = 11 : i64} {
  func.func @kernel(%arg0: i32, %arg1: memref<16x32xf32, #tpu.memory_space<vmem>>, %arg2: memref<96x256xf32, #tpu.memory_space<vmem>>, %arg3: memref<1x256xf32, #tpu.memory_space<vmem>>, %arg4: memref<768x256xf32, #tpu.memory_space<vmem>>, %arg5: memref<1x256xf32, #tpu.memory_space<vmem>>, %arg6: memref<768x256xf32, #tpu.memory_space<vmem>>, %arg7: memref<1x256xf32, #tpu.memory_space<vmem>>, %arg8: memref<768x8xf32, #tpu.memory_space<vmem>>, %arg9: memref<1x8xf32, #tpu.memory_space<vmem>>, %arg10: memref<16x256xf32, #tpu.memory_space<vmem>>, %arg11: memref<1x1xf32, #tpu.memory_space<vmem>>, %arg12: memref<16x8xf32, #tpu.memory_space<vmem>>, %arg13: memref<1x2xf32, #tpu.memory_space<vmem>>) attributes {dimension_semantics = [#tpu.dimension_semantics<parallel>], iteration_bounds = array<i64: 1>, scalar_prefetch = 0 : i64, scratch_operands = 0 : i64, tpu.core_type = #tpu.core_type<tc>, window_params = [{transform_indices = @transform_0, window_bounds = array<i64: 16, 32>}, {pipeline_mode = #tpu.pipeline_mode<synchronous>, transform_indices = @transform_1, window_bounds = array<i64: 96, 256>}, {pipeline_mode = #tpu.pipeline_mode<synchronous>, transform_indices = @transform_2, window_bounds = array<i64: 1, 256>}, {pipeline_mode = #tpu.pipeline_mode<synchronous>, transform_indices = @transform_3, window_bounds = array<i64: 768, 256>}, {pipeline_mode = #tpu.pipeline_mode<synchronous>, transform_indices = @transform_4, window_bounds = array<i64: 1, 256>}, {pipeline_mode = #tpu.pipeline_mode<synchronous>, transform_indices = @transform_5, window_bounds = array<i64: 768, 256>}, {pipeline_mode = #tpu.pipeline_mode<synchronous>, transform_indices = @transform_6, window_bounds = array<i64: 1, 256>}, {pipeline_mode = #tpu.pipeline_mode<synchronous>, transform_indices = @transform_7, window_bounds = array<i64: 768, 8>}, {pipeline_mode = #tpu.pipeline_mode<synchronous>, transform_indices = @transform_8, window_bounds = array<i64: 1, 8>}, {pipeline_mode = #tpu.pipeline_mode<synchronous>, transform_indices = @transform_9, window_bounds = array<i64: 16, 256>}, {pipeline_mode = #tpu.pipeline_mode<synchronous>, transform_indices = @transform_10, window_bounds = array<i64: 1, 1>}, {transform_indices = @transform_11, window_bounds = array<i64: 16, 8>}, {transform_indices = @transform_12, window_bounds = array<i64: 1, 2>}]} {
    %0 = tpu.iota {dimensions = array<i32: 0>} : vector<16x1xi32>
    %c8_i32 = arith.constant 8 : i32
    %c0_i32 = arith.constant 0 : i32
    %1 = arith.cmpi eq, %c8_i32, %c0_i32 : i32
    %c1_i32 = arith.constant 1 : i32
    %2 = arith.select %1, %c1_i32, %c8_i32 : i32
    %3 = vector.broadcast %2 : i32 to vector<16x1xi32>
    %4 = arith.remsi %0, %3 : vector<16x1xi32>
    %c0_i32_0 = arith.constant 0 : i32
    %5 = vector.broadcast %c0_i32_0 : i32 to vector<16x1xi32>
    %6 = arith.cmpi ne, %4, %5 : vector<16x1xi32>
    %c0_i32_1 = arith.constant 0 : i32
    %7 = vector.broadcast %c0_i32_1 : i32 to vector<16x1xi32>
    %8 = arith.cmpi slt, %4, %7 : vector<16x1xi32>
    %c0_i32_2 = arith.constant 0 : i32
    %9 = arith.cmpi slt, %2, %c0_i32_2 : i32
    %10 = vector.broadcast %9 : i1 to vector<16x1xi1>
    %11 = vector.broadcast %10 : vector<16x1xi1> to vector<16x1xi1>
    %12 = arith.xori %8, %11 : vector<16x1xi1>
    %13 = arith.andi %12, %6 : vector<16x1xi1>
    %14 = vector.broadcast %2 : i32 to vector<16x1xi32>
    %15 = arith.addi %4, %14 : vector<16x1xi32>
    %16 = arith.select %13, %15, %4 : vector<16x1xi1>, vector<16x1xi32>
    %c-1_i32 = arith.constant -1 : i32
    %17 = vector.broadcast %c-1_i32 : i32 to vector<16x1xi32>
    %18 = arith.addi %16, %17 : vector<16x1xi32>
    %c0_i32_3 = arith.constant 0 : i32
    %19 = vector.broadcast %c0_i32_3 : i32 to vector<16x1xi32>
    %20 = arith.cmpi sge, %18, %19 : vector<16x1xi32>
    %c-1_i32_4 = arith.constant -1 : i32
    %21 = vector.broadcast %c-1_i32_4 : i32 to vector<16x1xi32>
    %22 = arith.addi %16, %21 : vector<16x1xi32>
    %c8_i32_5 = arith.constant 8 : i32
    %23 = vector.broadcast %c8_i32_5 : i32 to vector<16x1xi32>
    %24 = arith.cmpi slt, %22, %23 : vector<16x1xi32>
    %25 = arith.andi %20, %24 : vector<16x1xi1>
    %c1_i32_6 = arith.constant 1 : i32
    %26 = vector.broadcast %c1_i32_6 : i32 to vector<16x1xi32>
    %27 = arith.addi %16, %26 : vector<16x1xi32>
    %c0_i32_7 = arith.constant 0 : i32
    %28 = vector.broadcast %c0_i32_7 : i32 to vector<16x1xi32>
    %29 = arith.cmpi sge, %27, %28 : vector<16x1xi32>
    %c1_i32_8 = arith.constant 1 : i32
    %30 = vector.broadcast %c1_i32_8 : i32 to vector<16x1xi32>
    %31 = arith.addi %16, %30 : vector<16x1xi32>
    %c8_i32_9 = arith.constant 8 : i32
    %32 = vector.broadcast %c8_i32_9 : i32 to vector<16x1xi32>
    %33 = arith.cmpi slt, %31, %32 : vector<16x1xi32>
    %34 = arith.andi %29, %33 : vector<16x1xi1>
    %c0 = arith.constant 0 : index
    %c0_10 = arith.constant 0 : index
    %35 = vector.load %arg1[%c0, %c0_10] : memref<16x32xf32, #tpu.memory_space<vmem>>, vector<16x32xf32>
    %cst = arith.constant 0.000000e+00 : f32
    %36 = vector.broadcast %cst : f32 to vector<1x32xf32>
    %37 = vector.extract_strided_slice %35 {offsets = [0, 0], sizes = [15, 32], strides = [1, 1]} : vector<16x32xf32> to vector<15x32xf32>
    %38 = tpu.concatenate %36, %37 in 0 : vector<1x32xf32>, vector<15x32xf32> -> vector<16x32xf32>
    %cst_11 = arith.constant 0.000000e+00 : f32
    %39 = vector.shape_cast %25 : vector<16x1xi1> to vector<16x1xi1>
    %40 = vector.broadcast %39 : vector<16x1xi1> to vector<16x32xi1>
    %41 = vector.broadcast %cst_11 : f32 to vector<16x32xf32>
    %42 = arith.select %40, %38, %41 : vector<16x32xi1>, vector<16x32xf32>
    %cst_12 = arith.constant 0.000000e+00 : f32
    %43 = vector.broadcast %cst_12 : f32 to vector<1x32xf32>
    %44 = vector.extract_strided_slice %35 {offsets = [1, 0], sizes = [15, 32], strides = [1, 1]} : vector<16x32xf32> to vector<15x32xf32>
    %45 = tpu.concatenate %44, %43 in 0 : vector<15x32xf32>, vector<1x32xf32> -> vector<16x32xf32>
    %cst_13 = arith.constant 0.000000e+00 : f32
    %46 = vector.shape_cast %34 : vector<16x1xi1> to vector<16x1xi1>
    %47 = vector.broadcast %46 : vector<16x1xi1> to vector<16x32xi1>
    %48 = vector.broadcast %cst_13 : f32 to vector<16x32xf32>
    %49 = arith.select %47, %45, %48 : vector<16x32xi1>, vector<16x32xf32>
    %50 = tpu.concatenate %42, %35, %49 in 1 : vector<16x32xf32>, vector<16x32xf32>, vector<16x32xf32> -> vector<16x96xf32>
    %c0_14 = arith.constant 0 : index
    %c0_15 = arith.constant 0 : index
    %51 = vector.load %arg2[%c0_14, %c0_15] : memref<96x256xf32, #tpu.memory_space<vmem>>, vector<96x256xf32>
    %cst_16 = arith.constant dense<0.000000e+00> : vector<16x256xf32>
    %52 = tpu.matmul %50, %51, %cst_16 {dimension_numbers = #tpu.dot_dimension_numbers<[1], [0], [0], [1], [0, 0, 1, 1], [], []>} : vector<16x96xf32>, vector<96x256xf32>, vector<16x256xf32> -> vector<16x256xf32>
    %c0_17 = arith.constant 0 : index
    %c0_18 = arith.constant 0 : index
    %53 = vector.load %arg3[%c0_17, %c0_18] : memref<1x256xf32, #tpu.memory_space<vmem>>, vector<1x256xf32>
    %54 = vector.broadcast %53 : vector<1x256xf32> to vector<16x256xf32>
    %55 = arith.addf %52, %54 : vector<16x256xf32>
    %cst_19 = arith.constant 0.000000e+00 : f32
    %56 = vector.broadcast %cst_19 : f32 to vector<16x256xf32>
    %57 = arith.maximumf %55, %56 : vector<16x256xf32>
    %cst_20 = arith.constant 0.000000e+00 : f32
    %58 = vector.broadcast %cst_20 : f32 to vector<1x256xf32>
    %59 = vector.extract_strided_slice %57 {offsets = [0, 0], sizes = [15, 256], strides = [1, 1]} : vector<16x256xf32> to vector<15x256xf32>
    %60 = tpu.concatenate %58, %59 in 0 : vector<1x256xf32>, vector<15x256xf32> -> vector<16x256xf32>
    %cst_21 = arith.constant 0.000000e+00 : f32
    %61 = vector.shape_cast %25 : vector<16x1xi1> to vector<16x1xi1>
    %62 = vector.broadcast %61 : vector<16x1xi1> to vector<16x256xi1>
    %63 = vector.broadcast %cst_21 : f32 to vector<16x256xf32>
    %64 = arith.select %62, %60, %63 : vector<16x256xi1>, vector<16x256xf32>
    %cst_22 = arith.constant 0.000000e+00 : f32
    %65 = vector.broadcast %cst_22 : f32 to vector<1x256xf32>
    %66 = vector.extract_strided_slice %57 {offsets = [1, 0], sizes = [15, 256], strides = [1, 1]} : vector<16x256xf32> to vector<15x256xf32>
    %67 = tpu.concatenate %66, %65 in 0 : vector<15x256xf32>, vector<1x256xf32> -> vector<16x256xf32>
    %cst_23 = arith.constant 0.000000e+00 : f32
    %68 = vector.shape_cast %34 : vector<16x1xi1> to vector<16x1xi1>
    %69 = vector.broadcast %68 : vector<16x1xi1> to vector<16x256xi1>
    %70 = vector.broadcast %cst_23 : f32 to vector<16x256xf32>
    %71 = arith.select %69, %67, %70 : vector<16x256xi1>, vector<16x256xf32>
    %72 = tpu.concatenate %64, %57, %71 in 1 : vector<16x256xf32>, vector<16x256xf32>, vector<16x256xf32> -> vector<16x768xf32>
    %c0_24 = arith.constant 0 : index
    %c0_25 = arith.constant 0 : index
    %73 = vector.load %arg4[%c0_24, %c0_25] : memref<768x256xf32, #tpu.memory_space<vmem>>, vector<768x256xf32>
    %cst_26 = arith.constant dense<0.000000e+00> : vector<16x256xf32>
    %74 = tpu.matmul %72, %73, %cst_26 {dimension_numbers = #tpu.dot_dimension_numbers<[1], [0], [0], [1], [0, 0, 1, 1], [], []>} : vector<16x768xf32>, vector<768x256xf32>, vector<16x256xf32> -> vector<16x256xf32>
    %c0_27 = arith.constant 0 : index
    %c0_28 = arith.constant 0 : index
    %75 = vector.load %arg5[%c0_27, %c0_28] : memref<1x256xf32, #tpu.memory_space<vmem>>, vector<1x256xf32>
    %76 = vector.broadcast %75 : vector<1x256xf32> to vector<16x256xf32>
    %77 = arith.addf %74, %76 : vector<16x256xf32>
    %cst_29 = arith.constant 0.000000e+00 : f32
    %78 = vector.broadcast %cst_29 : f32 to vector<16x256xf32>
    %79 = arith.maximumf %77, %78 : vector<16x256xf32>
    %cst_30 = arith.constant 0.000000e+00 : f32
    %80 = vector.broadcast %cst_30 : f32 to vector<1x256xf32>
    %81 = vector.extract_strided_slice %79 {offsets = [0, 0], sizes = [15, 256], strides = [1, 1]} : vector<16x256xf32> to vector<15x256xf32>
    %82 = tpu.concatenate %80, %81 in 0 : vector<1x256xf32>, vector<15x256xf32> -> vector<16x256xf32>
    %cst_31 = arith.constant 0.000000e+00 : f32
    %83 = vector.shape_cast %25 : vector<16x1xi1> to vector<16x1xi1>
    %84 = vector.broadcast %83 : vector<16x1xi1> to vector<16x256xi1>
    %85 = vector.broadcast %cst_31 : f32 to vector<16x256xf32>
    %86 = arith.select %84, %82, %85 : vector<16x256xi1>, vector<16x256xf32>
    %cst_32 = arith.constant 0.000000e+00 : f32
    %87 = vector.broadcast %cst_32 : f32 to vector<1x256xf32>
    %88 = vector.extract_strided_slice %79 {offsets = [1, 0], sizes = [15, 256], strides = [1, 1]} : vector<16x256xf32> to vector<15x256xf32>
    %89 = tpu.concatenate %88, %87 in 0 : vector<15x256xf32>, vector<1x256xf32> -> vector<16x256xf32>
    %cst_33 = arith.constant 0.000000e+00 : f32
    %90 = vector.shape_cast %34 : vector<16x1xi1> to vector<16x1xi1>
    %91 = vector.broadcast %90 : vector<16x1xi1> to vector<16x256xi1>
    %92 = vector.broadcast %cst_33 : f32 to vector<16x256xf32>
    %93 = arith.select %91, %89, %92 : vector<16x256xi1>, vector<16x256xf32>
    %94 = tpu.concatenate %86, %79, %93 in 1 : vector<16x256xf32>, vector<16x256xf32>, vector<16x256xf32> -> vector<16x768xf32>
    %c0_34 = arith.constant 0 : index
    %c0_35 = arith.constant 0 : index
    %95 = vector.load %arg6[%c0_34, %c0_35] : memref<768x256xf32, #tpu.memory_space<vmem>>, vector<768x256xf32>
    %cst_36 = arith.constant dense<0.000000e+00> : vector<16x256xf32>
    %96 = tpu.matmul %94, %95, %cst_36 {dimension_numbers = #tpu.dot_dimension_numbers<[1], [0], [0], [1], [0, 0, 1, 1], [], []>} : vector<16x768xf32>, vector<768x256xf32>, vector<16x256xf32> -> vector<16x256xf32>
    %c0_37 = arith.constant 0 : index
    %c0_38 = arith.constant 0 : index
    %97 = vector.load %arg7[%c0_37, %c0_38] : memref<1x256xf32, #tpu.memory_space<vmem>>, vector<1x256xf32>
    %98 = vector.broadcast %97 : vector<1x256xf32> to vector<16x256xf32>
    %99 = arith.addf %96, %98 : vector<16x256xf32>
    %100 = arith.addf %57, %99 : vector<16x256xf32>
    %cst_39 = arith.constant 0.000000e+00 : f32
    %101 = vector.broadcast %cst_39 : f32 to vector<16x256xf32>
    %102 = arith.maximumf %100, %101 : vector<16x256xf32>
    %cst_40 = arith.constant 0.000000e+00 : f32
    %103 = vector.broadcast %cst_40 : f32 to vector<1x256xf32>
    %104 = vector.extract_strided_slice %102 {offsets = [0, 0], sizes = [15, 256], strides = [1, 1]} : vector<16x256xf32> to vector<15x256xf32>
    %105 = tpu.concatenate %103, %104 in 0 : vector<1x256xf32>, vector<15x256xf32> -> vector<16x256xf32>
    %cst_41 = arith.constant 0.000000e+00 : f32
    %106 = vector.shape_cast %25 : vector<16x1xi1> to vector<16x1xi1>
    %107 = vector.broadcast %106 : vector<16x1xi1> to vector<16x256xi1>
    %108 = vector.broadcast %cst_41 : f32 to vector<16x256xf32>
    %109 = arith.select %107, %105, %108 : vector<16x256xi1>, vector<16x256xf32>
    %cst_42 = arith.constant 0.000000e+00 : f32
    %110 = vector.broadcast %cst_42 : f32 to vector<1x256xf32>
    %111 = vector.extract_strided_slice %102 {offsets = [1, 0], sizes = [15, 256], strides = [1, 1]} : vector<16x256xf32> to vector<15x256xf32>
    %112 = tpu.concatenate %111, %110 in 0 : vector<15x256xf32>, vector<1x256xf32> -> vector<16x256xf32>
    %cst_43 = arith.constant 0.000000e+00 : f32
    %113 = vector.shape_cast %34 : vector<16x1xi1> to vector<16x1xi1>
    %114 = vector.broadcast %113 : vector<16x1xi1> to vector<16x256xi1>
    %115 = vector.broadcast %cst_43 : f32 to vector<16x256xf32>
    %116 = arith.select %114, %112, %115 : vector<16x256xi1>, vector<16x256xf32>
    %117 = tpu.concatenate %109, %102, %116 in 1 : vector<16x256xf32>, vector<16x256xf32>, vector<16x256xf32> -> vector<16x768xf32>
    %c0_44 = arith.constant 0 : index
    %c0_45 = arith.constant 0 : index
    %118 = vector.load %arg8[%c0_44, %c0_45] : memref<768x8xf32, #tpu.memory_space<vmem>>, vector<768x8xf32>
    %cst_46 = arith.constant dense<0.000000e+00> : vector<16x8xf32>
    %119 = tpu.matmul %117, %118, %cst_46 {dimension_numbers = #tpu.dot_dimension_numbers<[1], [0], [0], [1], [0, 0, 1, 1], [], []>} : vector<16x768xf32>, vector<768x8xf32>, vector<16x8xf32> -> vector<16x8xf32>
    %c0_47 = arith.constant 0 : index
    %c0_48 = arith.constant 0 : index
    %120 = vector.load %arg9[%c0_47, %c0_48] : memref<1x8xf32, #tpu.memory_space<vmem>>, vector<1x8xf32>
    %121 = vector.broadcast %120 : vector<1x8xf32> to vector<16x8xf32>
    %122 = arith.addf %119, %121 : vector<16x8xf32>
    %c0_49 = arith.constant 0 : index
    %c0_50 = arith.constant 0 : index
    %123 = vector.load %arg12[%c0_49, %c0_50] : memref<16x8xf32, #tpu.memory_space<vmem>>, vector<16x8xf32>
    tpu.vector_store %arg12[%c0_49, %c0_50], %122 {strides = array<i32>} : memref<16x8xf32, #tpu.memory_space<vmem>>, vector<16x8xf32>,
    %c0_51 = arith.constant 0 : index
    %c0_52 = arith.constant 0 : index
    %124 = vector.load %arg10[%c0_51, %c0_52] : memref<16x256xf32, #tpu.memory_space<vmem>>, vector<16x256xf32>
    %125 = arith.mulf %102, %124 : vector<16x256xf32>
    %cst_53 = arith.constant dense<0.000000e+00> : vector<16xf32>
    %126 = vector.multi_reduction <add>, %125, %cst_53 [1] : vector<16x256xf32> to vector<16xf32>
    %127 = vector.shape_cast %126 : vector<16xf32> to vector<16x1xf32>
    %128 = vector.extract_strided_slice %127 {offsets = [0, 0], sizes = [8, 1], strides = [1, 1]} : vector<16x1xf32> to vector<8x1xf32>
    %cst_54 = arith.constant dense<0.000000e+00> : vector<1xf32>
    %129 = vector.multi_reduction <add>, %128, %cst_54 [0] : vector<8x1xf32> to vector<1xf32>
    %130 = vector.shape_cast %129 : vector<1xf32> to vector<1x1xf32>
    %131 = vector.extract_strided_slice %127 {offsets = [8, 0], sizes = [8, 1], strides = [1, 1]} : vector<16x1xf32> to vector<8x1xf32>
    %cst_55 = arith.constant dense<0.000000e+00> : vector<1xf32>
    %132 = vector.multi_reduction <add>, %131, %cst_55 [0] : vector<8x1xf32> to vector<1xf32>
    %133 = vector.shape_cast %132 : vector<1xf32> to vector<1x1xf32>
    %134 = tpu.concatenate %130, %133 in 1 : vector<1x1xf32>, vector<1x1xf32> -> vector<1x2xf32>
    %c0_56 = arith.constant 0 : index
    %c0_57 = arith.constant 0 : index
    %135 = vector.load %arg11[%c0_56, %c0_57] : memref<1x1xf32, #tpu.memory_space<vmem>>, vector<1x1xf32>
    %136 = vector.broadcast %135 : vector<1x1xf32> to vector<1x2xf32>
    %137 = arith.addf %134, %136 : vector<1x2xf32>
    %c0_58 = arith.constant 0 : index
    %c0_59 = arith.constant 0 : index
    %138 = vector.load %arg13[%c0_58, %c0_59] : memref<1x2xf32, #tpu.memory_space<vmem>>, vector<1x2xf32>
    tpu.vector_store %arg13[%c0_58, %c0_59], %137 {strides = array<i32>} : memref<1x2xf32, #tpu.memory_space<vmem>>, vector<1x2xf32>,
    return
  }
  func.func @transform_0(%arg0: i32) -> (i32, i32) {
    %c0_i32 = arith.constant 0 : i32
    %c0_i32_0 = arith.constant 0 : i32
    return %arg0, %c0_i32 : i32, i32
  }
  func.func @transform_1(%arg0: i32) -> (i32, i32) {
    %c0_i32 = arith.constant 0 : i32
    %c0_i32_0 = arith.constant 0 : i32
    %c0_i32_1 = arith.constant 0 : i32
    return %c0_i32, %c0_i32_0 : i32, i32
  }
  func.func @transform_2(%arg0: i32) -> (i32, i32) {
    %c0_i32 = arith.constant 0 : i32
    %c0_i32_0 = arith.constant 0 : i32
    %c0_i32_1 = arith.constant 0 : i32
    return %c0_i32, %c0_i32_0 : i32, i32
  }
  func.func @transform_3(%arg0: i32) -> (i32, i32) {
    %c0_i32 = arith.constant 0 : i32
    %c0_i32_0 = arith.constant 0 : i32
    %c0_i32_1 = arith.constant 0 : i32
    return %c0_i32, %c0_i32_0 : i32, i32
  }
  func.func @transform_4(%arg0: i32) -> (i32, i32) {
    %c0_i32 = arith.constant 0 : i32
    %c0_i32_0 = arith.constant 0 : i32
    %c0_i32_1 = arith.constant 0 : i32
    return %c0_i32, %c0_i32_0 : i32, i32
  }
  func.func @transform_5(%arg0: i32) -> (i32, i32) {
    %c0_i32 = arith.constant 0 : i32
    %c0_i32_0 = arith.constant 0 : i32
    %c0_i32_1 = arith.constant 0 : i32
    return %c0_i32, %c0_i32_0 : i32, i32
  }
  func.func @transform_6(%arg0: i32) -> (i32, i32) {
    %c0_i32 = arith.constant 0 : i32
    %c0_i32_0 = arith.constant 0 : i32
    %c0_i32_1 = arith.constant 0 : i32
    return %c0_i32, %c0_i32_0 : i32, i32
  }
  func.func @transform_7(%arg0: i32) -> (i32, i32) {
    %c0_i32 = arith.constant 0 : i32
    %c0_i32_0 = arith.constant 0 : i32
    %c0_i32_1 = arith.constant 0 : i32
    return %c0_i32, %c0_i32_0 : i32, i32
  }
  func.func @transform_8(%arg0: i32) -> (i32, i32) {
    %c0_i32 = arith.constant 0 : i32
    %c0_i32_0 = arith.constant 0 : i32
    %c0_i32_1 = arith.constant 0 : i32
    return %c0_i32, %c0_i32_0 : i32, i32
  }
  func.func @transform_9(%arg0: i32) -> (i32, i32) {
    %c0_i32 = arith.constant 0 : i32
    %c0_i32_0 = arith.constant 0 : i32
    %c0_i32_1 = arith.constant 0 : i32
    return %c0_i32, %c0_i32_0 : i32, i32
  }
  func.func @transform_10(%arg0: i32) -> (i32, i32) {
    %c0_i32 = arith.constant 0 : i32
    %c0_i32_0 = arith.constant 0 : i32
    %c0_i32_1 = arith.constant 0 : i32
    return %c0_i32, %c0_i32_0 : i32, i32
  }
  func.func @transform_11(%arg0: i32) -> (i32, i32) {
    %c0_i32 = arith.constant 0 : i32
    %c0_i32_0 = arith.constant 0 : i32
    return %arg0, %c0_i32 : i32, i32
  }
  func.func @transform_12(%arg0: i32) -> (i32, i32) {
    %c0_i32 = arith.constant 0 : i32
    %c0_i32_0 = arith.constant 0 : i32
    return %arg0, %c0_i32 : i32, i32
  }
}

</mosaic_0001>

<bundles_post_ra>
// kernel: auction_convnet_forward.1
= control target key start
LH: loop header
LB: loop body
LE: loop exit
PB: predicated region body
PF: predicated region fallthrough
CT: control target
= control target key end

     0   :  { %s3189_s0 = inlined_call_operand.vmem [shape: f32[16,32], index: 0, kind: input, shape index: {}]   ;;  %s3190_s1 = inlined_call_operand.vmem [shape: f32[96,256], index: 1, kind: input, shape index: {}]   ;;  %s3191_s2 = inlined_call_operand.vmem [shape: f32[1,256], index: 2, kind: input, shape index: {}]   ;;  %s3192_s3 = inlined_call_operand.hbm [shape: f32[768,256], index: 3, kind: input, shape index: {}]   ;;  %s3193_s4 = inlined_call_operand.vmem [shape: f32[1,256], index: 4, kind: input, shape index: {}]   ;;  %s3194_s5 = inlined_call_operand.hbm [shape: f32[768,256], index: 5, kind: input, shape index: {}]   ;;  %s3195_s6 = inlined_call_operand.vmem [shape: f32[1,256], index: 6, kind: input, shape index: {}]   ;;  %s3196_s7 = inlined_call_operand.vmem [shape: f32[768,8], index: 7, kind: input, shape index: {}]   ;;  %s3197_s8 = inlined_call_operand.vmem [shape: f32[1,8], index: 8, kind: input, shape index: {}]   ;;  %s3198_s9 = inlined_call_operand.vmem [shape: f32[16,256], index: 9, kind: input, shape index: {}]   ;;  %s3199_s10 = inlined_call_operand.<no memory space> [shape: f32[1,1], index: 10, kind: input, shape index: {}]   ;;  %s3200_s11 = inlined_call_operand.hbm [shape: f32[16,8], index: 11, kind: output, shape index: {0}]   ;;  %s3201_s12 = inlined_call_operand.hbm [shape: f32[1,2], index: 12, kind: output, shape index: {1}]  }
   0x1   :  { %v18_v0 = vstv %s3199_s10 }
   0x2   :  { %19 = vst [vmem:[#allocation2] sm:$0x1] %v18_v0 }
   0x3   :  { %20 = vsyncpa [#allocation4], 0 }
   0x4   :  { %21 = vsyncpa [#allocation7], 0 }
   0x5   :  { %22 = vsyncpa [#allocation5], 0 }
   0x6   :  { %23 = vsyncpa [#allocation10], 0  ;;  %s2461_s23 = smov [#allocation3]   ;;  %s2365_s27 = scalar_lea.hbm %s3192_s3, 24576 }
   0x7   :  { %s35_s24 = sshll.u32 %s2461_s23, 4  ;;  %p2366_p0 = scmp.ne.s32.totalorder %s3192_s3, %s2365_s27  ;;  %s36_s24 = int_to_ptr.vmem [resolvable:$true] %s35_s24 }
   0x8   :  { %p2369_p1 = scmp.lt.u32.totalorder %s2365_s27, %s3192_s3 }
   0xa   :  { %p2371_p2 = pnand %p2369_p1, %p2366_p0 }
   0xc   :  { %2374 = shalt.err (!%p2371_p2)
}
   0xd   :  { %s2375_s10 = scalar_lea.vmem %s36_s24, 24576  ;;  %p2380_p4 = scmp.lt.s32.totalorder %s36_s24, %s36_s24 }
   0xe   :  { %p2376_p3 = scmp.ne.s32.totalorder %s36_s24, %s2375_s10  ;;  %p2381_p5 = scmp.lt.s32.totalorder %s2375_s10, %s2375_s10 }
  0x10   :  { %p2382_p6 = por %p2381_p5, %p2380_p4 }
  0x12   :  { %p2383_p7 = pnand %p2382_p6, %p2376_p3 }
  0x14   :  { %2386 = shalt.err (!%p2383_p7)
}
  0x15   :  { %s2462_s14 = smov 256   ;;  %s2463_s15 = smov 16  }
  0x16   :  { %41 = dma.hbm_to_vmem [thread:$0]  %s3192_s3, 24576, %s36_s24, [#allocation4], %s2462_s14, %s2462_s14, %s2463_s15  }
  0x17   :  { %s2464_s18 = smov [#allocation6]   ;;  %s2387_s22 = scalar_lea.hbm %s3194_s5, 24576 }
  0x18   :  { %s49_s19 = sshll.u32 %s2464_s18, 4  ;;  %p2388_p8 = scmp.ne.s32.totalorder %s3194_s5, %s2387_s22  ;;  %s50_s19 = int_to_ptr.vmem [resolvable:$true] %s49_s19 }
  0x19   :  { %p2391_p9 = scmp.lt.u32.totalorder %s2387_s22, %s3194_s5 }
  0x1b   :  { %p2393_p10 = pnand %p2391_p9, %p2388_p8 }
  0x1d   :  { %2396 = shalt.err (!%p2393_p10)
}
  0x1e   :  { %s2397_s28 = scalar_lea.vmem %s50_s19, 24576  ;;  %p2402_p12 = scmp.lt.s32.totalorder %s50_s19, %s50_s19 }
  0x1f   :  { %p2398_p11 = scmp.ne.s32.totalorder %s50_s19, %s2397_s28  ;;  %p2403_p13 = scmp.lt.s32.totalorder %s2397_s28, %s2397_s28 }
  0x21   :  { %p2404_p0 = por %p2403_p13, %p2402_p12 }
  0x23   :  { %p2405_p1 = pnand %p2404_p0, %p2398_p11 }
  0x25   :  { %2408 = shalt.err (!%p2405_p1)
}
  0x26   :  { %55 = dma.hbm_to_vmem [thread:$0]  %s3194_s5, 24576, %s50_s19, [#allocation7], %s2462_s14, %s2462_s14, %s2463_s15  }
  0x27   :  { %2453 = dma.done.wait [#allocation4], 24576  }
  0x28   :  { %2454 = vsyncadd [#allocation4], 4294942720 }
  0x29   :  { %2455 = dma.done.wait [#allocation7], 24576  }
  0x2a   :  { %2456 = vsyncadd [#allocation7], 4294942720  ;;  %v72_v1 = vlaneseq  ;;  %v2465_v3 = vmov 0.0   ;;  %v2580_v8 = vld [vmem:[%s3189_s0] sm:$0xff]  ;;  %v116_v9 = vld [vmem:[%s3189_s0 + $0x8] sm:$0xff]  ;;  %vm132_vm0 = vcmask 1046528  }
  0x2b   :  { %272 = vmatprep.mubr.f32.mxu0 %v2465_v3  ;;  %v166_v10 = vld [vmem:[%s3190_s1 + $0x8] sm:$0xff]  ;;  %s2466_s15 = smov 32   ;;  %v133_v11 = vrot.slane %v2580_v8, 1  ;;  %v134_v12 = vrot.slane %v116_v9, 1  ;;  %v168_v13 = vld [vmem:[%s3190_s1 + $0x18] sm:$0xff]  ;;  %v165_v14 = vld [vmem:[%s3190_s1] sm:$0xff] }
  0x2c   :  { %v2565_v2 = vshrl.u32 %v72_v1, 7  ;;  %145 = vrot.lane.b32.xlu0 %v2580_v8, %s2466_s15  ;;  %147 = vrot.lane.b32.xlu1 %v116_v9, %s2466_s15  ;;  %v121_v15 = vrot.slane %v116_v9, 7  ;;  %v1824_v17 = vpack.c.bf16 %v168_v13, %v166_v10  ;;  %v167_v18 = vld [vmem:[%s3190_s1 + $0x10] sm:$0xff]  ;;  %v170_v19 = vld [vmem:[%s3190_s1 + $0x28] sm:$0xff]  ;;  %v120_v28 = vrot.slane %v2580_v8, 7  ;;  %s2467_s13 = smov 64  }
  0x2d   :  { %v172_v20 = vld [vmem:[%s3190_s1 + $0x38] sm:$0xff]  ;;  %v135_v21 = vsel %vm132_vm0, %v133_v11, %v134_v12  ;;  %v138_v22 = vsel %vm132_vm0, %v134_v12, 0.0  ;;  %v1826_v23 = vpack.c.bf16 %v167_v18, %v165_v14  ;;  %v169_v25 = vld [vmem:[%s3190_s1 + $0x20] sm:$0xff]  ;;  %v171_v26 = vld [vmem:[%s3190_s1 + $0x30] sm:$0xff]  ;;  %vm119_vm3 = vcmask 1040384  }
  0x2e   :  { %v79_v4 = vand.u32 7, %v2565_v2  ;;  %v2570_v5 = vadd.s32 8, %v2565_v2  ;;  %v1828_v24 = vpack.c.bf16 %v172_v20, %v170_v19  ;;  %v174_v27 = vld [vmem:[%s3190_s1 + $0x48] sm:$0xff]  ;;  %1825 = vmatprep.subr.bf16.mxu0 %v1824_v17  ;;  %v176_v30 = vld [vmem:[%s3190_s1 + $0x58] sm:$0xff]  ;;  %v1830_v32 = vpack.c.bf16 %v171_v26, %v169_v25  ;;  %v173_v34 = vld [vmem:[%s3190_s1 + $0x40] sm:$0xff] }
  0x2f   :  { %1827 = vmatpush1.bf16.msra.mxu0 %v1826_v23  ;;  %v1832_v33 = vpack.c.bf16 %v176_v30, %v174_v27  ;;  %v175_v35 = vld [vmem:[%s3190_s1 + $0x50] sm:$0xff]  ;;  %v2639_v36 = vsel %vm119_vm3, %v120_v28, %v121_v15  ;;  %v178_v37 = vld [vmem:[%s3190_s1 + $0x68] sm:$0xff]  ;;  %v180_v38 = vld [vmem:[%s3190_s1 + $0x78] sm:$0xff]  ;;  %vm159_vm6 = vcmask 261120   ;;  %vm162_vm7 = vcmask 523264  }
  0x30   :  { %v2574_v6 = vadd.s32 1, %v79_v4  ;;  %v86_v7 = vand.u32 7, %v2570_v5  ;;  %1829 = vmatprep.subr.bf16.mxu0 %v1828_v24  ;;  %v177_v39 = vld [vmem:[%s3190_s1 + $0x60] sm:$0xff]  ;;  %v179_v40 = vld [vmem:[%s3190_s1 + $0x70] sm:$0xff]  ;;  %v1834_v41 = vpack.c.bf16 %v175_v35, %v173_v34  ;;  %v182_v42 = vld [vmem:[%s3190_s1 + $0x88] sm:$0xff]  ;;  %v1836_v47 = vpack.c.bf16 %v180_v38, %v178_v37 }
  0x31   :  { %v184_v43 = vld [vmem:[%s3190_s1 + $0x98] sm:$0xff]  ;;  %v326_v44 = vld [vmem:[#allocation3 + $0x8] sm:$0xff]  ;;  %v325_v46 = vld [vmem:[#allocation3] sm:$0xff]  ;;  %v1838_v58 = vpack.c.bf16 %v179_v40, %v177_v39  ;;  %vm201_vm8 = vcmask 785408   ;;  %vm1636_vm9 = vcmask 7168   ;;  %vm1649_vm10 = vcmask 8192  }
  0x32   :  { %vm111_vm1 = vcmp.lt.s32.totalorder %v2574_v6, 8  ;;  %v2599_v16 = vadd.s32 1, %v86_v7  ;;  %v328_v45 = vld [vmem:[#allocation3 + $0x18] sm:$0xff]  ;;  %v327_v49 = vld [vmem:[#allocation3 + $0x10] sm:$0xff]  ;;  %v330_v50 = vld [vmem:[#allocation3 + $0x28] sm:$0xff]  ;;  %v1840_v62 = vpack.c.bf16 %v184_v43, %v182_v42 }
  0x33   :  { %v143_v29 = vsel %vm111_vm1, %v135_v21, 0.0  ;;  %1831 = vmatpush1.bf16.msra.mxu0 %v1830_v32  ;;  %v1848_v48 = vpack.c.bf16 %v328_v45, %v326_v44  ;;  %v332_v51 = vld [vmem:[#allocation3 + $0x38] sm:$0xff]  ;;  %v1850_v52 = vpack.c.bf16 %v327_v49, %v325_v46  ;;  %v329_v54 = vld [vmem:[#allocation3 + $0x20] sm:$0xff]  ;;  %v331_v55 = vld [vmem:[#allocation3 + $0x30] sm:$0xff] }
  0x34   :  { %vm112_vm2 = vcmp.lt.s32.totalorder %v2599_v16, 8  ;;  %153 = vrot.lane.b32.xlu0 %v143_v29, %s2467_s13  ;;  %1833 = vmatprep.subr.bf16.mxu0 %v1832_v33  ;;  %v1852_v53 = vpack.c.bf16 %v332_v51, %v330_v50  ;;  %v334_v56 = vld [vmem:[#allocation3 + $0x48] sm:$0xff]  ;;  %v336_v57 = vld [vmem:[#allocation3 + $0x58] sm:$0xff]  ;;  %v1854_v61 = vpack.c.bf16 %v331_v55, %v329_v54  ;;  %v333_v1 = vld [vmem:[#allocation3 + $0x40] sm:$0xff] }
  0x35   :  { %v144_v31 = vsel %vm112_vm2, %v138_v22, 0.0  ;;  %1849 = vmatprep.subr.bf16.mxu1 %v1848_v48  ;;  %v181_v59 = vld [vmem:[%s3190_s1 + $0x80] sm:$0xff]  ;;  %v183_v60 = vld [vmem:[%s3190_s1 + $0x90] sm:$0xff]  ;;  %v186_v63 = vld [vmem:[%s3190_s1 + $0xa8] sm:$0xff]  ;;  %v1856_v0 = vpack.c.bf16 %v336_v57, %v334_v56 }
  0x36   :  { %155 = vrot.lane.b32.xlu1 %v144_v31, %s2467_s13  ;;  %1851 = vmatpush1.bf16.msra.mxu1 %v1850_v52  ;;  %v335_v9 = vld [vmem:[#allocation3 + $0x50] sm:$0xff]  ;;  %v338_v11 = vld [vmem:[#allocation3 + $0x68] sm:$0xff]  ;;  %v340_v12 = vld [vmem:[#allocation3 + $0x78] sm:$0xff]  ;;  %v1842_v13 = vpack.c.bf16 %v183_v60, %v181_v59 }
  0x37   :  { %1835 = vmatpush1.bf16.msra.mxu0 %v1834_v41  ;;  %1853 = vmatprep.subr.bf16.mxu1 %v1852_v53  ;;  %v188_v10 = vld [vmem:[%s3190_s1 + $0xb8] sm:$0xff]  ;;  %v185_v14 = vld [vmem:[%s3190_s1 + $0xa0] sm:$0xff]  ;;  %v1858_v15 = vpack.c.bf16 %v335_v9, %v333_v1  ;;  %v187_v18 = vld [vmem:[%s3190_s1 + $0xb0] sm:$0xff]  ;;  %v1860_v19 = vpack.c.bf16 %v340_v12, %v338_v11 }
  0x38   :  { %1837 = vmatprep.subr.bf16.mxu0 %v1836_v47  ;;  %v1844_v17 = vpack.c.bf16 %v188_v10, %v186_v63  ;;  %v337_v20 = vld [vmem:[#allocation3 + $0x60] sm:$0xff]  ;;  %v339_v21 = vld [vmem:[#allocation3 + $0x70] sm:$0xff]  ;;  %v342_v22 = vld [vmem:[#allocation3 + $0x88] sm:$0xff]  ;;  %v1846_v24 = vpack.c.bf16 %v187_v18, %v185_v14 }
  0x39   :  { %v344_v23 = vld [vmem:[#allocation3 + $0x98] sm:$0xff]  ;;  %v1862_v25 = vpack.c.bf16 %v339_v21, %v337_v20  ;;  %v341_v27 = vld [vmem:[#allocation3 + $0x80] sm:$0xff]  ;;  %v343_v29 = vld [vmem:[#allocation3 + $0x90] sm:$0xff] }
  0x3a   :  { %1855 = vmatpush1.bf16.msra.mxu1 %v1854_v61  ;;  %v1864_v26 = vpack.c.bf16 %v344_v23, %v342_v22  ;;  %v346_v30 = vld [vmem:[#allocation3 + $0xa8] sm:$0xff]  ;;  %v348_v31 = vld [vmem:[#allocation3 + $0xb8] sm:$0xff]  ;;  %v1866_v32 = vpack.c.bf16 %v343_v29, %v341_v27  ;;  %v345_v34 = vld [vmem:[#allocation3 + $0xa0] sm:$0xff] }
  0x3b   :  { %1839 = vmatpush1.bf16.msra.mxu0 %v1838_v58  ;;  %1857 = vmatprep.subr.bf16.mxu1 %v1856_v0  ;;  %v1868_v33 = vpack.c.bf16 %v348_v31, %v346_v30  ;;  %v347_v35 = vld [vmem:[#allocation3 + $0xb0] sm:$0xff]  ;;  %v350_v37 = vld [vmem:[#allocation3 + $0xc8] sm:$0xff]  ;;  %v352_v38 = vld [vmem:[#allocation3 + $0xd8] sm:$0xff]  ;;  %v2679_v31 = vadd.s32 4294967295, %v79_v4 }
  0x3c   :  { %1841 = vmatprep.subr.bf16.mxu0 %v1840_v62  ;;  %v1870_v39 = vpack.c.bf16 %v347_v35, %v345_v34  ;;  %v1872_v40 = vpack.c.bf16 %v352_v38, %v350_v37  ;;  %v349_v41 = vld [vmem:[#allocation3 + $0xc0] sm:$0xff]  ;;  %v351_v42 = vld [vmem:[#allocation3 + $0xd0] sm:$0xff]  ;;  %v354_v43 = vld [vmem:[#allocation3 + $0xe8] sm:$0xff] }
  0x3d   :  { %v356_v44 = vld [vmem:[#allocation3 + $0xf8] sm:$0xff]  ;;  %v1874_v45 = vpack.c.bf16 %v351_v42, %v349_v41  ;;  %v353_v47 = vld [vmem:[#allocation3 + $0xe0] sm:$0xff]  ;;  %v355_v48 = vld [vmem:[#allocation3 + $0xf0] sm:$0xff]  ;;  %vm101_vm4 = vcmp.ge.s32.totalorder %v2679_v31, 0 }
  0x3e   :  { %1859 = vmatpush1.bf16.msra.mxu1 %v1858_v15  ;;  %v1876_v46 = vpack.c.bf16 %v356_v44, %v354_v43  ;;  %v358_v49 = vld [vmem:[#allocation3 + $0x108] sm:$0xff]  ;;  %v360_v50 = vld [vmem:[#allocation3 + $0x118] sm:$0xff]  ;;  %v1878_v51 = vpack.c.bf16 %v355_v48, %v353_v47  ;;  %v357_v53 = vld [vmem:[#allocation3 + $0x100] sm:$0xff] }
  0x3f   :  { %1843 = vmatpush1.bf16.msra.mxu0 %v1842_v13  ;;  %1861 = vmatprep.subr.bf16.mxu1 %v1860_v19  ;;  %v1880_v52 = vpack.c.bf16 %v360_v50, %v358_v49  ;;  %v359_v54 = vld [vmem:[#allocation3 + $0x110] sm:$0xff]  ;;  %v362_v55 = vld [vmem:[#allocation3 + $0x128] sm:$0xff]  ;;  %v364_v56 = vld [vmem:[#allocation3 + $0x138] sm:$0xff] }
  0x40   :  { %1845 = vmatprep.subr.bf16.mxu0 %v1844_v17  ;;  %v1882_v57 = vpack.c.bf16 %v359_v54, %v357_v53  ;;  %v1884_v58 = vpack.c.bf16 %v364_v56, %v362_v55  ;;  %v361_v59 = vld [vmem:[#allocation3 + $0x120] sm:$0xff]  ;;  %v363_v60 = vld [vmem:[#allocation3 + $0x130] sm:$0xff]  ;;  %v366_v61 = vld [vmem:[#allocation3 + $0x148] sm:$0xff]  ;;  %v2697_v53 = vsub.s32 0, %v2565_v2  ;;  %v2703_v55 = vsub.s32 1, %v2565_v2 }
  0x41   :  { %v368_v62 = vld [vmem:[#allocation3 + $0x158] sm:$0xff]  ;;  %v1886_v63 = vpack.c.bf16 %v363_v60, %v361_v59  ;;  %v365_v1 = vld [vmem:[#allocation3 + $0x140] sm:$0xff]  ;;  %v367_v9 = vld [vmem:[#allocation3 + $0x150] sm:$0xff] }
  0x42   :  { %1863 = vmatpush1.bf16.msra.mxu1 %v1862_v25  ;;  %v1888_v0 = vpack.c.bf16 %v368_v62, %v366_v61  ;;  %v370_v10 = vld [vmem:[#allocation3 + $0x168] sm:$0xff]  ;;  %v372_v11 = vld [vmem:[#allocation3 + $0x178] sm:$0xff]  ;;  %v1890_v12 = vpack.c.bf16 %v367_v9, %v365_v1  ;;  %v369_v14 = vld [vmem:[#allocation3 + $0x160] sm:$0xff] }
  0x43   :  { %1847 = vmatpush1.bf16.msra.mxu0 %v1846_v24  ;;  %1865 = vmatprep.subr.bf16.mxu1 %v1864_v26  ;;  %v1892_v13 = vpack.c.bf16 %v372_v11, %v370_v10  ;;  %v371_v15 = vld [vmem:[#allocation3 + $0x170] sm:$0xff]  ;;  %v374_v17 = vld [vmem:[#allocation3 + $0x188] sm:$0xff]  ;;  %v376_v18 = vld [vmem:[#allocation3 + $0x198] sm:$0xff] }
  0x44   :  { %v1894_v19 = vpack.c.bf16 %v371_v15, %v369_v14  ;;  %v1896_v20 = vpack.c.bf16 %v376_v18, %v374_v17  ;;  %v373_v21 = vld [vmem:[#allocation3 + $0x180] sm:$0xff]  ;;  %v375_v22 = vld [vmem:[#allocation3 + $0x190] sm:$0xff]  ;;  %v378_v23 = vld [vmem:[#allocation3 + $0x1a8] sm:$0xff] }
  0x45   :  { %v380_v24 = vld [vmem:[#allocation3 + $0x1b8] sm:$0xff]  ;;  %v1898_v25 = vpack.c.bf16 %v375_v22, %v373_v21  ;;  %v377_v27 = vld [vmem:[#allocation3 + $0x1a0] sm:$0xff]  ;;  %v379_v29 = vld [vmem:[#allocation3 + $0x1b0] sm:$0xff] }
  0x46   :  { %1867 = vmatpush1.bf16.msra.mxu1 %v1866_v32  ;;  %v1900_v26 = vpack.c.bf16 %v380_v24, %v378_v23  ;;  %v1902_v30 = vpack.c.bf16 %v379_v29, %v377_v27  ;;  %v2683_v32 = vadd.s32 4294967295, %v86_v7  ;;  %v384_v41 = vld [vmem:[#allocation3 + $0x1d8] sm:$0xff]  ;;  %v381_v43 = vld [vmem:[#allocation3 + $0x1c0] sm:$0xff]  ;;  %v383_v44 = vld [vmem:[#allocation3 + $0x1d0] sm:$0xff] }
  0x47   :  { %1869 = vmatprep.subr.bf16.mxu1 %v1868_v33  ;;  %v125_v33 = vsel %vm119_vm3, 0.0, %v120_v28  ;;  %v385_v48 = vld [vmem:[#allocation3 + $0x1e0] sm:$0xff]  ;;  %v387_v49 = vld [vmem:[#allocation3 + $0x1f0] sm:$0xff]  ;;  %v400_v27 = vld [vmem:[#allocation3 + $0x258] sm:$0xff] }
  0x48   :  { %vm102_vm5 = vcmp.ge.s32.totalorder %v2683_v32, 0  ;;  %v130_v37 = vsel %vm101_vm4, %v125_v33, 0.0  ;;  %v1910_v50 = vpack.c.bf16 %v387_v49, %v385_v48  ;;  %v189_v54 = vld [vmem:[%s3191_s2] sm:$0x3]  ;;  %v391_v9 = vld [vmem:[#allocation3 + $0x210] sm:$0xff] }
  0x49   :  { %v131_v4 = vsel %vm102_vm5, %v2639_v36, 0.0  ;;  %v386_v36 = vld [vmem:[#allocation3 + $0x1e8] sm:$0xff]  ;;  %v194_v56 = vrot.slane %v189_v54, %v2697_v53  ;;  %v389_v1 = vld [vmem:[#allocation3 + $0x200] sm:$0xff]  ;;  %v395_v23 = vld [vmem:[#allocation3 + $0x230] sm:$0xff] }
  0x4a   :  { %1871 = vmatpush1.bf16.msra.mxu1 %v1870_v39  ;;  %v1914_v18 = vpack.c.bf16 %v391_v9, %v389_v1  ;;  %v393_v22 = vld [vmem:[#allocation3 + $0x220] sm:$0xff]  ;;  %v806_v49 = vld [vmem:[#allocation6 + $0x30] sm:$0xff]  ;;  %v813_v1 = vld [vmem:[#allocation6 + $0x68] sm:$0xff] }
  0x4b   :  { %1873 = vmatprep.subr.bf16.mxu1 %v1872_v40  ;;  %v382_v40 = vld [vmem:[#allocation3 + $0x1c8] sm:$0xff]  ;;  %v804_v48 = vld [vmem:[#allocation6 + $0x20] sm:$0xff]  ;;  %v815_v9 = vld [vmem:[#allocation6 + $0x78] sm:$0xff] }
  0x4c   :  { %v1904_v42 = vpack.c.bf16 %v384_v41, %v382_v40  ;;  %v800_v40 = vld [vmem:[#allocation6] sm:$0xff] }
  0x4d   :  { %v1367_v32 = vld [vmem:[%s3196_s7 + $0x2c0] sm:$0xff] }
  0x4e   :  { %1875 = vmatpush1.bf16.msra.mxu1 %v1874_v45  ;;  %v1906_v45 = vpack.c.bf16 %v383_v44, %v381_v43  ;;  %v802_v43 = vld [vmem:[#allocation6 + $0x10] sm:$0xff]  ;;  %v805_v44 = vld [vmem:[#allocation6 + $0x28] sm:$0xff] }
  0x4f   :  { %1877 = vmatprep.subr.bf16.mxu1 %v1876_v46  ;;  %v388_v46 = vld [vmem:[#allocation3 + $0x1f8] sm:$0xff] }
  0x50   :  { %v1908_v47 = vpack.c.bf16 %v388_v46, %v386_v36  ;;  %v2042_v46 = vpack.c.bf16 %v802_v43, %v800_v40 }
  0x52   :  { %1879 = vmatpush1.bf16.msra.mxu1 %v1878_v51  ;;  %v390_v51 = vld [vmem:[#allocation3 + $0x208] sm:$0xff] }
  0x53   :  { %1881 = vmatprep.subr.bf16.mxu1 %v1880_v52  ;;  %v392_v52 = vld [vmem:[#allocation3 + $0x218] sm:$0xff] }
  0x56   :  { %1883 = vmatpush1.bf16.msra.mxu1 %v1882_v57  ;;  %v198_v57 = vrot.slane %v189_v54, %v2703_v55  ;;  %v2046_v54 = vpack.c.bf16 %v806_v49, %v804_v48 }
  0x57   :  { %1885 = vmatprep.subr.bf16.mxu1 %v1884_v58 }
  0x5a   :  { %1887 = vmatpush1.bf16.msra.mxu1 %v1886_v63 }
  0x5b   :  { %1889 = vmatprep.subr.bf16.mxu1 %v1888_v0 }
  0x5e   :  { %1891 = vmatpush1.bf16.msra.mxu1 %v1890_v12  ;;  %v394_v12 = vld [vmem:[#allocation3 + $0x228] sm:$0xff] }
  0x5f   :  { %1893 = vmatprep.subr.bf16.mxu1 %v1892_v13  ;;  %v396_v13 = vld [vmem:[#allocation3 + $0x238] sm:$0xff] }
  0x60   :  { %v1916_v21 = vpack.c.bf16 %v396_v13, %v394_v12  ;;  %v409_v13 = vld [vmem:[#allocation3 + $0x2a0] sm:$0xff] }
  0x62   :  { %1895 = vmatpush1.bf16.msra.mxu1 %v1894_v19 }
  0x63   :  { %1897 = vmatprep.subr.bf16.mxu1 %v1896_v20 }
  0x66   :  { %1899 = vmatpush1.bf16.msra.mxu1 %v1898_v25 }
  0x67   :  { %1901 = vmatprep.subr.bf16.mxu1 %v1900_v26  ;;  %v398_v26 = vld [vmem:[#allocation3 + $0x248] sm:$0xff] }
  0x6a   :  { %1903 = vmatpush1.bf16.msra.mxu1 %v1902_v30  ;;  %v1918_v30 = vpack.c.bf16 %v395_v23, %v393_v22  ;;  %v817_v22 = vld [vmem:[#allocation6 + $0x88] sm:$0xff]  ;;  %v819_v23 = vld [vmem:[#allocation6 + $0x98] sm:$0xff] }
  0x6b   :  { %1905 = vmatprep.subr.bf16.mxu1 %v1904_v42 }
  0x6e   :  { %1907 = vmatpush1.bf16.msra.mxu1 %v1906_v45  ;;  %v807_v45 = vld [vmem:[#allocation6 + $0x38] sm:$0xff] }
  0x6f   :  { %1909 = vmatprep.subr.bf16.mxu1 %v1908_v47  ;;  %v2044_v47 = vpack.c.bf16 %v807_v45, %v805_v44  ;;  %v419_v44 = vld [vmem:[#allocation3 + $0x2f0] sm:$0xff]  ;;  %v825_v45 = vld [vmem:[#allocation6 + $0xc8] sm:$0xff] }
  0x72   :  { %1911 = vmatpush1.bf16.msra.mxu1 %v1910_v50  ;;  %v809_v50 = vld [vmem:[#allocation6 + $0x48] sm:$0xff] }
  0x9e   :  { %v146_v34 = vpop.permute.xlu0 %145  ;;  %v148_v35 = vpop.permute.xlu1 %147 }
  0x9f   :  { %v160_v5 = vsel %vm159_vm6, %v130_v37, %v146_v34  ;;  %v161_v7 = vsel %vm159_vm6, %v131_v4, %v148_v35  ;;  %v1920_v34 = vpack.c.bf16 %v400_v27, %v398_v26  ;;  %v397_v35 = vld [vmem:[#allocation3 + $0x240] sm:$0xff]  ;;  %v399_v37 = vld [vmem:[#allocation3 + $0x250] sm:$0xff] }
  0xa0   :  { %v1922_v41 = vpack.c.bf16 %v399_v37, %v397_v35  ;;  %v415_v37 = vld [vmem:[#allocation3 + $0x2d0] sm:$0xff] }
  0xa6   :  { %v154_v38 = vpop.permute.xlu0 %153 }
  0xa7   :  { %v163_v8 = vsel %vm162_vm7, %v160_v5, %v154_v38  ;;  %v402_v5 = vld [vmem:[#allocation3 + $0x268] sm:$0xff]  ;;  %v401_v38 = vld [vmem:[#allocation3 + $0x260] sm:$0xff] }
  0xa8   :  { %v156_v39 = vpop.permute.xlu1 %155  ;;  %1683 = vmatmul.mubr.msk.f32.vlgmr.msra.gmra.mrb[0].mxu0 %vm201_vm8, %v163_v8  ;;  %v403_v8 = vld [vmem:[#allocation3 + $0x270] sm:$0xff] }
  0xa9   :  { %v164_v28 = vsel %vm162_vm7, %v161_v7, %v156_v39  ;;  %278 = vmatprep.mubr.f32.mxu0 %v2465_v3  ;;  %v1912_v3 = vpack.c.bf16 %v392_v52, %v390_v51  ;;  %v404_v7 = vld [vmem:[#allocation3 + $0x278] sm:$0xff]  ;;  %v801_v39 = vld [vmem:[#allocation6 + $0x8] sm:$0xff] }
  0xaa   :  { %v1924_v36 = vpack.c.bf16 %v404_v7, %v402_v5  ;;  %v406_v51 = vld [vmem:[#allocation3 + $0x288] sm:$0xff]  ;;  %v408_v52 = vld [vmem:[#allocation3 + $0x298] sm:$0xff] }
  0xab   :  { %1913 = vmatprep.subr.bf16.mxu1 %v1912_v3  ;;  %v811_v3 = vld [vmem:[#allocation6 + $0x58] sm:$0xff]  ;;  %v418_v7 = vld [vmem:[#allocation3 + $0x2e8] sm:$0xff] }
  0xac   :  { %1684 = vmatmul.mubr.msk.f32.gmra.mrb[2].mxu0 %vm201_vm8, %v164_v28  ;;  %v803_v28 = vld [vmem:[#allocation6 + $0x18] sm:$0xff] }
  0xad   :  { %v2040_v42 = vpack.c.bf16 %v803_v28, %v801_v39  ;;  %v823_v5 = vld [vmem:[#allocation6 + $0xb8] sm:$0xff]  ;;  %v417_v28 = vld [vmem:[#allocation3 + $0x2e0] sm:$0xff] }
  0xae   :  { %v1942_v49 = vpack.c.bf16 %v419_v44, %v417_v28  ;;  %v841_v28 = vld [vmem:[#allocation6 + $0x148] sm:$0xff] }
  0xaf   :  { %2041 = vmatprep.subr.bf16.mxu0 %v2040_v42  ;;  %v822_v42 = vld [vmem:[#allocation6 + $0xb0] sm:$0xff] }
  0xb0   :  { %2043 = vmatpush1.bf16.msra.mxu0 %v2042_v46  ;;  %v422_v46 = vld [vmem:[#allocation3 + $0x308] sm:$0xff] }
  0xb1   :  { %2045 = vmatprep.subr.bf16.mxu0 %v2044_v47  ;;  %v424_v47 = vld [vmem:[#allocation3 + $0x318] sm:$0xff] }
  0xb4   :  { %2047 = vmatpush1.bf16.msra.mxu0 %v2046_v54  ;;  %v1944_v54 = vpack.c.bf16 %v424_v47, %v422_v46  ;;  %v840_v46 = vld [vmem:[#allocation6 + $0x140] sm:$0xff]  ;;  %v842_v47 = vld [vmem:[#allocation6 + $0x150] sm:$0xff] }
 0x17b   :  { %v274_v58 = vpop.f32.mrb[0].mxu0 }
 0x17c   :  { %v275_v59 = vadd.f32 %v274_v58, %v194_v56  ;;  %v276_v60 = vpop.f32.mrb[1].mxu0  ;;  %v2048_v58 = vpack.c.bf16 %v811_v3, %v809_v50  ;;  %v421_v50 = vld [vmem:[#allocation3 + $0x300] sm:$0xff]  ;;  %v826_v3 = vld [vmem:[#allocation6 + $0xd0] sm:$0xff] }
 0x17d   :  { %v277_v61 = vadd.f32 %v276_v60, %v198_v57  ;;  %v810_v60 = vld [vmem:[#allocation6 + $0x50] sm:$0xff] }
 0x17e   :  { %v2707_v62 = vmax.f32 %v275_v59, 0.0  ;;  %v808_v59 = vld [vmem:[#allocation6 + $0x40] sm:$0xff]  ;;  %2049 = vmatprep.subr.bf16.mxu0 %v2048_v58  ;;  %v831_v58 = vld [vmem:[#allocation6 + $0xf8] sm:$0xff] }
 0x17f   :  { %v2709_v63 = vmax.f32 %v277_v61, 0.0  ;;  %v280_v0 = vpop.f32.mrb[2].mxu0  ;;  %v1928_v61 = vpack.c.bf16 %v408_v52, %v406_v51  ;;  %v824_v52 = vld [vmem:[#allocation6 + $0xc0] sm:$0xff] }
 0x180   :  { %v281_v10 = vadd.f32 %v280_v0, %v194_v56  ;;  %v282_v11 = vpop.f32.mrb[3].mxu0  ;;  %v293_v2 = vrot.slane %v2707_v62, 7  ;;  %v1926_v56 = vpack.c.bf16 %v403_v8, %v401_v38  ;;  %v407_v0 = vld [vmem:[#allocation3 + $0x290] sm:$0xff]  ;;  %v420_v38 = vld [vmem:[#allocation3 + $0x2f8] sm:$0xff] }
 0x181   :  { %v283_v14 = vadd.f32 %v282_v11, %v198_v57  ;;  %v294_v15 = vrot.slane %v2709_v63, 7  ;;  %v405_v57 = vld [vmem:[#allocation3 + $0x280] sm:$0xff]  ;;  %v412_v11 = vld [vmem:[#allocation3 + $0x2b8] sm:$0xff]  ;;  %v1940_v43 = vpack.c.bf16 %v420_v38, %v418_v7  ;;  %v838_v38 = vld [vmem:[#allocation6 + $0x130] sm:$0xff] }
 0x182   :  { %v2713_v17 = vmax.f32 %v281_v10, 0.0  ;;  %v303_v24 = vsel %vm119_vm3, 0.0, %v293_v2  ;;  %v410_v10 = vld [vmem:[#allocation3 + $0x2a8] sm:$0xff]  ;;  %v1930_v12 = vpack.c.bf16 %v407_v0, %v405_v57  ;;  %v836_v7 = vld [vmem:[#allocation6 + $0x120] sm:$0xff] }
 0x183   :  { %v2715_v19 = vmax.f32 %v283_v14, 0.0  ;;  %v304_v20 = vsel %vm119_vm3, 0.0, %v294_v15  ;;  %v2052_v14 = vpack.c.bf16 %v815_v9, %v813_v1  ;;  %v829_v57 = vld [vmem:[#allocation6 + $0xe8] sm:$0xff]  ;;  %v425_v1 = vld [vmem:[#allocation3 + $0x320] sm:$0xff] }
 0x184   :  { %1685 = vmatprep.mubr.msk.f32.mxu1 %vm101_vm4, %v304_v20  ;;  %v295_v25 = vrot.slane %v2713_v17, 7  ;;  %v1932_v20 = vpack.c.bf16 %v412_v11, %v410_v10  ;;  %v2068_v9 = vpack.c.bf16 %v831_v58, %v829_v57  ;;  %v828_v10 = vld [vmem:[#allocation6 + $0xe0] sm:$0xff]  ;;  %v830_v11 = vld [vmem:[#allocation6 + $0xf0] sm:$0xff] }
 0x185   :  { %1686 = vmatmul.mubr.msk.f32.vlgmr.msra.gmra.mrb[0].mxu1 %vm101_vm4, %v303_v24  ;;  %v297_v29 = vrot.slane %v2715_v19, 7  ;;  %v414_v24 = vld [vmem:[#allocation3 + $0x2c8] sm:$0xff]  ;;  %v441_v57 = vld [vmem:[#allocation3 + $0x3a0] sm:$0xff] }
 0x186   :  { %1915 = vmatpush1.bf16.msra.mxu1 %v1914_v18  ;;  %v296_v4 = vsel %vm119_vm3, %v293_v2, %v295_v25  ;;  %v2050_v2 = vpack.c.bf16 %v810_v60, %v808_v59  ;;  %v814_v18 = vld [vmem:[#allocation6 + $0x70] sm:$0xff]  ;;  %v416_v25 = vld [vmem:[#allocation3 + $0x2d8] sm:$0xff]  ;;  %v426_v59 = vld [vmem:[#allocation3 + $0x328] sm:$0xff] }
 0x187   :  { %v298_v33 = vsel %vm119_vm3, %v294_v15, %v297_v29  ;;  %1917 = vmatprep.subr.bf16.mxu1 %v1916_v21  ;;  %v812_v15 = vld [vmem:[#allocation6 + $0x60] sm:$0xff]  ;;  %v411_v21 = vld [vmem:[#allocation3 + $0x2b0] sm:$0xff]  ;;  %v1936_v35 = vpack.c.bf16 %v416_v25, %v414_v24  ;;  %v428_v60 = vld [vmem:[#allocation3 + $0x338] sm:$0xff] }
 0x188   :  { %1687 = vmatprep.mubr.msk.f32.mxu1 %vm102_vm5, %v298_v33  ;;  %2051 = vmatpush1.bf16.msra.mxu0 %v2050_v2  ;;  %v2054_v26 = vpack.c.bf16 %v814_v18, %v812_v15  ;;  %v1934_v27 = vpack.c.bf16 %v411_v21, %v409_v13  ;;  %v413_v29 = vld [vmem:[#allocation3 + $0x2c0] sm:$0xff]  ;;  %v1948_v2 = vpack.c.bf16 %v428_v60, %v426_v59  ;;  %v833_v13 = vld [vmem:[#allocation6 + $0x108] sm:$0xff]  ;;  %v432_v18 = vld [vmem:[#allocation3 + $0x358] sm:$0xff] }
 0x189   :  { %1688 = vmatmul.mubr.msk.f32.gmra.mrb[2].mxu1 %vm102_vm5, %v296_v4  ;;  %2053 = vmatprep.subr.bf16.mxu0 %v2052_v14  ;;  %v816_v33 = vld [vmem:[#allocation6 + $0x80] sm:$0xff]  ;;  %v821_v4 = vld [vmem:[#allocation6 + $0xa8] sm:$0xff]  ;;  %v1938_v39 = vpack.c.bf16 %v415_v37, %v413_v29  ;;  %v835_v14 = vld [vmem:[#allocation6 + $0x118] sm:$0xff] }
 0x18a   :  { %1919 = vmatpush1.bf16.msra.mxu1 %v1918_v30  ;;  %670 = vmatprep.mubr.f32.mxu1 %v2709_v63  ;;  %v2056_v30 = vpack.c.bf16 %v819_v23, %v817_v22  ;;  %v2060_v40 = vpack.c.bf16 %v823_v5, %v821_v4  ;;  %v430_v15 = vld [vmem:[#allocation3 + $0x348] sm:$0xff]  ;;  %v429_v22 = vld [vmem:[#allocation3 + $0x340] sm:$0xff]  ;;  %v2072_v23 = vpack.c.bf16 %v835_v14, %v833_v13  ;;  %v834_v25 = vld [vmem:[#allocation6 + $0x110] sm:$0xff] }
 0x18b   :  { %1921 = vmatprep.subr.bf16.mxu1 %v1920_v34  ;;  %v818_v34 = vld [vmem:[#allocation6 + $0x90] sm:$0xff]  ;;  %v832_v24 = vld [vmem:[#allocation6 + $0x100] sm:$0xff]  ;;  %v837_v29 = vld [vmem:[#allocation6 + $0x128] sm:$0xff] }
 0x18c   :  { %2055 = vmatpush1.bf16.msra.mxu0 %v2054_v26  ;;  %v2058_v8 = vpack.c.bf16 %v818_v34, %v816_v33  ;;  %v1952_v26 = vpack.c.bf16 %v432_v18, %v430_v15  ;;  %v434_v33 = vld [vmem:[#allocation3 + $0x368] sm:$0xff]  ;;  %v436_v34 = vld [vmem:[#allocation3 + $0x378] sm:$0xff]  ;;  %v433_v4 = vld [vmem:[#allocation3 + $0x360] sm:$0xff] }
 0x18d   :  { %2057 = vmatprep.subr.bf16.mxu0 %v2056_v30  ;;  %v839_v30 = vld [vmem:[#allocation6 + $0x138] sm:$0xff]  ;;  %v844_v59 = vld [vmem:[#allocation6 + $0x160] sm:$0xff]  ;;  %v846_v60 = vld [vmem:[#allocation6 + $0x170] sm:$0xff] }
 0x18e   :  { %1923 = vmatpush1.bf16.msra.mxu1 %v1922_v41  ;;  %v820_v41 = vld [vmem:[#allocation6 + $0xa0] sm:$0xff]  ;;  %v2076_v5 = vpack.c.bf16 %v839_v30, %v837_v29  ;;  %v850_v18 = vld [vmem:[#allocation6 + $0x190] sm:$0xff] }
 0x18f   :  { %1925 = vmatprep.subr.bf16.mxu1 %v1924_v36  ;;  %v827_v36 = vld [vmem:[#allocation6 + $0xd8] sm:$0xff]  ;;  %v2062_v48 = vpack.c.bf16 %v822_v42, %v820_v41  ;;  %v438_v41 = vld [vmem:[#allocation3 + $0x388] sm:$0xff]  ;;  %v445_v13 = vld [vmem:[#allocation3 + $0x3c0] sm:$0xff] }
 0x190   :  { %2059 = vmatpush1.bf16.msra.mxu0 %v2058_v8  ;;  %v2064_v51 = vpack.c.bf16 %v827_v36, %v825_v45  ;;  %v1956_v8 = vpack.c.bf16 %v436_v34, %v434_v33  ;;  %v440_v42 = vld [vmem:[#allocation3 + $0x398] sm:$0xff]  ;;  %v437_v45 = vld [vmem:[#allocation3 + $0x380] sm:$0xff]  ;;  %v854_v33 = vld [vmem:[#allocation6 + $0x1b0] sm:$0xff] }
 0x191   :  { %2061 = vmatprep.subr.bf16.mxu0 %v2060_v40  ;;  %v843_v40 = vld [vmem:[#allocation6 + $0x158] sm:$0xff]  ;;  %v848_v15 = vld [vmem:[#allocation6 + $0x180] sm:$0xff] }
 0x192   :  { %1927 = vmatpush1.bf16.msra.mxu1 %v1926_v56  ;;  %v423_v56 = vld [vmem:[#allocation3 + $0x310] sm:$0xff]  ;;  %v2080_v36 = vpack.c.bf16 %v843_v40, %v841_v28  ;;  %v852_v30 = vld [vmem:[#allocation6 + $0x1a0] sm:$0xff]  ;;  %v458_v40 = vld [vmem:[#allocation3 + $0x428] sm:$0xff] }
 0x193   :  { %1929 = vmatprep.subr.bf16.mxu1 %v1928_v61  ;;  %v2066_v61 = vpack.c.bf16 %v826_v3, %v824_v52  ;;  %v1946_v0 = vpack.c.bf16 %v423_v56, %v421_v50  ;;  %v845_v50 = vld [vmem:[#allocation6 + $0x168] sm:$0xff]  ;;  %v444_v3 = vld [vmem:[#allocation3 + $0x3b8] sm:$0xff]  ;;  %v455_v28 = vld [vmem:[#allocation3 + $0x410] sm:$0xff] }
 0x194   :  { %2063 = vmatpush1.bf16.msra.mxu0 %v2062_v48  ;;  %v1960_v48 = vpack.c.bf16 %v440_v42, %v438_v41  ;;  %v442_v52 = vld [vmem:[#allocation3 + $0x3a8] sm:$0xff]  ;;  %v460_v41 = vld [vmem:[#allocation3 + $0x438] sm:$0xff] }
 0x195   :  { %2065 = vmatprep.subr.bf16.mxu0 %v2064_v51  ;;  %v847_v51 = vld [vmem:[#allocation6 + $0x178] sm:$0xff] }
 0x196   :  { %1931 = vmatpush1.bf16.msra.mxu1 %v1930_v12  ;;  %v427_v12 = vld [vmem:[#allocation3 + $0x330] sm:$0xff]  ;;  %v2084_v58 = vpack.c.bf16 %v847_v51, %v845_v50  ;;  %v461_v51 = vld [vmem:[#allocation3 + $0x440] sm:$0xff] }
 0x197   :  { %1933 = vmatprep.subr.bf16.mxu1 %v1932_v20  ;;  %v2070_v20 = vpack.c.bf16 %v830_v11, %v828_v10  ;;  %v1950_v21 = vpack.c.bf16 %v427_v12, %v425_v1  ;;  %v849_v1 = vld [vmem:[#allocation6 + $0x188] sm:$0xff]  ;;  %v448_v11 = vld [vmem:[#allocation3 + $0x3d8] sm:$0xff] }
 0x198   :  { %2067 = vmatpush1.bf16.msra.mxu0 %v2066_v61  ;;  %v1964_v61 = vpack.c.bf16 %v444_v3, %v442_v52  ;;  %v446_v10 = vld [vmem:[#allocation3 + $0x3c8] sm:$0xff]  ;;  %v463_v52 = vld [vmem:[#allocation3 + $0x450] sm:$0xff] }
 0x199   :  { %2069 = vmatprep.subr.bf16.mxu0 %v2068_v9  ;;  %v851_v9 = vld [vmem:[#allocation6 + $0x198] sm:$0xff]  ;;  %v466_v3 = vld [vmem:[#allocation3 + $0x468] sm:$0xff] }
 0x19a   :  { %1935 = vmatpush1.bf16.msra.mxu1 %v1934_v27  ;;  %v431_v27 = vld [vmem:[#allocation3 + $0x350] sm:$0xff]  ;;  %v2088_v14 = vpack.c.bf16 %v851_v9, %v849_v1 }
 0x19b   :  { %1937 = vmatprep.subr.bf16.mxu1 %v1936_v35  ;;  %v2074_v35 = vpack.c.bf16 %v834_v25, %v832_v24  ;;  %v1954_v37 = vpack.c.bf16 %v431_v27, %v429_v22  ;;  %v853_v22 = vld [vmem:[#allocation6 + $0x1a8] sm:$0xff]  ;;  %v452_v25 = vld [vmem:[#allocation3 + $0x3f8] sm:$0xff] }
 0x19c   :  { %2071 = vmatpush1.bf16.msra.mxu0 %v2070_v20  ;;  %v1968_v20 = vpack.c.bf16 %v448_v11, %v446_v10  ;;  %v450_v24 = vld [vmem:[#allocation3 + $0x3e8] sm:$0xff]  ;;  %v469_v10 = vld [vmem:[#allocation3 + $0x480] sm:$0xff]  ;;  %v471_v11 = vld [vmem:[#allocation3 + $0x490] sm:$0xff] }
 0x19d   :  { %2073 = vmatprep.subr.bf16.mxu0 %v2072_v23  ;;  %v855_v23 = vld [vmem:[#allocation6 + $0x1b8] sm:$0xff]  ;;  %v1972_v34 = vpack.c.bf16 %v452_v25, %v450_v24  ;;  %v477_v24 = vld [vmem:[#allocation3 + $0x4c0] sm:$0xff]  ;;  %v479_v25 = vld [vmem:[#allocation3 + $0x4d0] sm:$0xff] }
 0x19e   :  { %1939 = vmatpush1.bf16.msra.mxu1 %v1938_v39  ;;  %v435_v39 = vld [vmem:[#allocation3 + $0x370] sm:$0xff]  ;;  %v2092_v29 = vpack.c.bf16 %v855_v23, %v853_v22 }
 0x19f   :  { %1941 = vmatprep.subr.bf16.mxu1 %v1940_v43  ;;  %v2078_v43 = vpack.c.bf16 %v838_v38, %v836_v7  ;;  %v1958_v44 = vpack.c.bf16 %v435_v39, %v433_v4  ;;  %v454_v4 = vld [vmem:[#allocation3 + $0x408] sm:$0xff]  ;;  %v2094_v7 = vpack.c.bf16 %v854_v33, %v852_v30  ;;  %v453_v39 = vld [vmem:[#allocation3 + $0x400] sm:$0xff] }
 0x1a0   :  { %2075 = vmatpush1.bf16.msra.mxu0 %v2074_v35  ;;  %v449_v35 = vld [vmem:[#allocation3 + $0x3e0] sm:$0xff]  ;;  %v1978_v42 = vpack.c.bf16 %v455_v28, %v453_v39  ;;  %v492_v39 = vld [vmem:[#allocation3 + $0x538] sm:$0xff] }
 0x1a1   :  { %2077 = vmatprep.subr.bf16.mxu0 %v2076_v5  ;;  %v456_v5 = vld [vmem:[#allocation3 + $0x418] sm:$0xff]  ;;  %v481_v33 = vld [vmem:[#allocation3 + $0x4e0] sm:$0xff] }
 0x1a2   :  { %1943 = vmatpush1.bf16.msra.mxu1 %v1942_v49  ;;  %v439_v49 = vld [vmem:[#allocation3 + $0x390] sm:$0xff] }
 0x1a3   :  { %1945 = vmatprep.subr.bf16.mxu1 %v1944_v54  ;;  %v2082_v54 = vpack.c.bf16 %v842_v47, %v840_v46  ;;  %v1962_v56 = vpack.c.bf16 %v439_v49, %v437_v45  ;;  %v459_v45 = vld [vmem:[#allocation3 + $0x430] sm:$0xff]  ;;  %v464_v46 = vld [vmem:[#allocation3 + $0x458] sm:$0xff]  ;;  %v313_v47 = vrot.slane %v2715_v19, 1  ;;  %v312_v49 = vrot.slane %v2709_v63, 1 }
 0x1a4   :  { %2079 = vmatpush1.bf16.msra.mxu0 %v2078_v43  ;;  %v1980_v43 = vpack.c.bf16 %v460_v41, %v458_v40  ;;  %v489_v41 = vld [vmem:[#allocation3 + $0x520] sm:$0xff] }
 0x1a5   :  { %2081 = vmatprep.subr.bf16.mxu0 %v2080_v36  ;;  %v462_v36 = vld [vmem:[#allocation3 + $0x448] sm:$0xff] }
 0x1a6   :  { %1947 = vmatpush1.bf16.msra.mxu1 %v1946_v0  ;;  %v443_v0 = vld [vmem:[#allocation3 + $0x3b0] sm:$0xff]  ;;  %v1984_v50 = vpack.c.bf16 %v464_v46, %v462_v36  ;;  %v493_v46 = vld [vmem:[#allocation3 + $0x540] sm:$0xff] }
 0x1a7   :  { %1949 = vmatprep.subr.bf16.mxu1 %v1948_v2  ;;  %v2086_v2 = vpack.c.bf16 %v846_v60, %v844_v59  ;;  %v1966_v12 = vpack.c.bf16 %v443_v0, %v441_v57  ;;  %v1986_v57 = vpack.c.bf16 %v463_v52, %v461_v51  ;;  %v465_v59 = vld [vmem:[#allocation3 + $0x460] sm:$0xff]  ;;  %v467_v60 = vld [vmem:[#allocation3 + $0x470] sm:$0xff]  ;;  %v472_v0 = vld [vmem:[#allocation3 + $0x498] sm:$0xff] }
 0x1a8   :  { %2083 = vmatpush1.bf16.msra.mxu0 %v2082_v54  ;;  %v468_v54 = vld [vmem:[#allocation3 + $0x478] sm:$0xff]  ;;  %v1990_v1 = vpack.c.bf16 %v467_v60, %v465_v59  ;;  %v501_v60 = vld [vmem:[#allocation3 + $0x580] sm:$0xff] }
 0x1a9   :  { %2085 = vmatprep.subr.bf16.mxu0 %v2084_v58  ;;  %v1988_v58 = vpack.c.bf16 %v468_v54, %v466_v3  ;;  %v497_v3 = vld [vmem:[#allocation3 + $0x560] sm:$0xff]  ;;  %v499_v54 = vld [vmem:[#allocation3 + $0x570] sm:$0xff] }
 0x1aa   :  { %1951 = vmatpush1.bf16.msra.mxu1 %v1950_v21  ;;  %v447_v21 = vld [vmem:[#allocation3 + $0x3d0] sm:$0xff] }
 0x1ab   :  { %1953 = vmatprep.subr.bf16.mxu1 %v1952_v26  ;;  %v2090_v26 = vpack.c.bf16 %v850_v18, %v848_v15  ;;  %v1970_v27 = vpack.c.bf16 %v447_v21, %v445_v13  ;;  %v1994_v13 = vpack.c.bf16 %v471_v11, %v469_v10  ;;  %v473_v15 = vld [vmem:[#allocation3 + $0x4a0] sm:$0xff]  ;;  %v475_v18 = vld [vmem:[#allocation3 + $0x4b0] sm:$0xff]  ;;  %v480_v21 = vld [vmem:[#allocation3 + $0x4d8] sm:$0xff] }
 0x1ac   :  { %2087 = vmatpush1.bf16.msra.mxu0 %v2086_v2  ;;  %v474_v2 = vld [vmem:[#allocation3 + $0x4a8] sm:$0xff]  ;;  %v1998_v22 = vpack.c.bf16 %v475_v18, %v473_v15  ;;  %v505_v11 = vld [vmem:[#allocation3 + $0x5a0] sm:$0xff] }
 0x1ad   :  { %2089 = vmatprep.subr.bf16.mxu0 %v2088_v14  ;;  %v509_v18 = vld [vmem:[#allocation3 + $0x5c0] sm:$0xff] }
 0x1ae   :  { %1955 = vmatpush1.bf16.msra.mxu1 %v1954_v37  ;;  %v451_v37 = vld [vmem:[#allocation3 + $0x3f0] sm:$0xff] }
 0x1af   :  { %1957 = vmatprep.subr.bf16.mxu1 %v1956_v8  ;;  %v1974_v38 = vpack.c.bf16 %v451_v37, %v449_v35  ;;  %v1976_v8 = vpack.c.bf16 %v456_v5, %v454_v4  ;;  %v486_v35 = vld [vmem:[#allocation3 + $0x508] sm:$0xff]  ;;  %v488_v37 = vld [vmem:[#allocation3 + $0x518] sm:$0xff] }
 0x1b0   :  { %2091 = vmatpush1.bf16.msra.mxu0 %v2090_v26  ;;  %v482_v26 = vld [vmem:[#allocation3 + $0x4e8] sm:$0xff]  ;;  %v2008_v5 = vpack.c.bf16 %v488_v37, %v486_v35 }
 0x1b1   :  { %2093 = vmatprep.subr.bf16.mxu0 %v2092_v29  ;;  %v2002_v29 = vpack.c.bf16 %v479_v25, %v477_v24  ;;  %v513_v25 = vld [vmem:[#allocation3 + $0x5e0] sm:$0xff]  ;;  %v857_v37 = vld [vmem:[#allocation6 + $0x1c8] sm:$0xff] }
 0x1b2   :  { %1959 = vmatpush1.bf16.msra.mxu1 %v1958_v44  ;;  %v457_v44 = vld [vmem:[#allocation3 + $0x420] sm:$0xff] }
 0x1b3   :  { %1961 = vmatprep.subr.bf16.mxu1 %v1960_v48  ;;  %v1982_v48 = vpack.c.bf16 %v459_v45, %v457_v44  ;;  %v496_v44 = vld [vmem:[#allocation3 + $0x558] sm:$0xff] }
 0x1b4   :  { %2095 = vmatpush1.bf16.msra.mxu0 %v2094_v7  ;;  %v485_v7 = vld [vmem:[#allocation3 + $0x500] sm:$0xff] }
 0x1b6   :  { %1963 = vmatpush1.bf16.msra.mxu1 %v1962_v56  ;;  %v314_v56 = vsel %vm132_vm0, %v312_v49, %v313_v47  ;;  %v498_v49 = vld [vmem:[#allocation3 + $0x568] sm:$0xff] }
 0x1b7   :  { %1965 = vmatprep.subr.bf16.mxu1 %v1964_v61  ;;  %v470_v61 = vld [vmem:[#allocation3 + $0x488] sm:$0xff] }
 0x1b8   :  { %v1992_v9 = vpack.c.bf16 %v472_v0, %v470_v61  ;;  %v503_v61 = vld [vmem:[#allocation3 + $0x590] sm:$0xff]  ;;  %v506_v0 = vld [vmem:[#allocation3 + $0x5a8] sm:$0xff] }
 0x1ba   :  { %1967 = vmatpush1.bf16.msra.mxu1 %v1966_v12  ;;  %v476_v12 = vld [vmem:[#allocation3 + $0x4b8] sm:$0xff] }
 0x1bb   :  { %1969 = vmatprep.subr.bf16.mxu1 %v1968_v20  ;;  %v1996_v14 = vpack.c.bf16 %v476_v12, %v474_v2  ;;  %v478_v20 = vld [vmem:[#allocation3 + $0x4c8] sm:$0xff]  ;;  %v507_v2 = vld [vmem:[#allocation3 + $0x5b0] sm:$0xff] }
 0x1bc   :  { %v2000_v23 = vpack.c.bf16 %v480_v21, %v478_v20  ;;  %v510_v12 = vld [vmem:[#allocation3 + $0x5c8] sm:$0xff]  ;;  %v511_v20 = vld [vmem:[#allocation3 + $0x5d0] sm:$0xff] }
 0x1bd   :  { %v514_v21 = vld [vmem:[#allocation3 + $0x5e8] sm:$0xff] }
 0x1be   :  { %1971 = vmatpush1.bf16.msra.mxu1 %v1970_v27  ;;  %v484_v27 = vld [vmem:[#allocation3 + $0x4f8] sm:$0xff] }
 0x1bf   :  { %1973 = vmatprep.subr.bf16.mxu1 %v1972_v34  ;;  %v2004_v30 = vpack.c.bf16 %v484_v27, %v482_v26  ;;  %v483_v34 = vld [vmem:[#allocation3 + $0x4f0] sm:$0xff] }
 0x1c0   :  { %v2006_v4 = vpack.c.bf16 %v483_v34, %v481_v33  ;;  %v515_v26 = vld [vmem:[#allocation3 + $0x5f0] sm:$0xff]  ;;  %v320_v34 = vsel %vm132_vm0, %v313_v47, 0.0  ;;  %v860_v47 = vld [vmem:[#allocation6 + $0x1e0] sm:$0xff] }
 0x1c1   :  { %v2038_v27 = vpack.c.bf16 %v515_v26, %v513_v25 }
 0x1c2   :  { %1975 = vmatpush1.bf16.msra.mxu1 %v1974_v38  ;;  %v487_v38 = vld [vmem:[#allocation3 + $0x510] sm:$0xff] }
 0x1c3   :  { %1977 = vmatprep.subr.bf16.mxu1 %v1976_v8  ;;  %v490_v8 = vld [vmem:[#allocation3 + $0x528] sm:$0xff]  ;;  %v2010_v28 = vpack.c.bf16 %v487_v38, %v485_v7  ;;  %v856_v7 = vld [vmem:[#allocation6 + $0x1c0] sm:$0xff]  ;;  %v858_v38 = vld [vmem:[#allocation6 + $0x1d0] sm:$0xff] }
 0x1c4   :  { %v2012_v40 = vpack.c.bf16 %v492_v39, %v490_v8  ;;  %v2098_v8 = vpack.c.bf16 %v858_v38, %v856_v7  ;;  %v861_v39 = vld [vmem:[#allocation6 + $0x1e8] sm:$0xff] }
 0x1c5   :  { %671 = vmatmul.mubr.f32.vlgmr.msra.gmra.mrb[0].mxu1 %v2707_v62  ;;  %v1296_v7 = vld [vmem:[%s3196_s7 + $0x88] sm:$0xff] }
 0x1c6   :  { %676 = vmatprep.mubr.f32.mxu1 %v2715_v19  ;;  %1979 = vmatpush1.bf16.msra.mxu1 %v1978_v42  ;;  %v491_v42 = vld [vmem:[#allocation3 + $0x530] sm:$0xff] }
 0x1c7   :  { %1981 = vmatprep.subr.bf16.mxu1 %v1980_v43  ;;  %v494_v43 = vld [vmem:[#allocation3 + $0x548] sm:$0xff]  ;;  %v2014_v45 = vpack.c.bf16 %v491_v42, %v489_v41  ;;  %v862_v41 = vld [vmem:[#allocation6 + $0x1f0] sm:$0xff] }
 0x1c8   :  { %v2016_v36 = vpack.c.bf16 %v496_v44, %v494_v43  ;;  %v2102_v42 = vpack.c.bf16 %v862_v41, %v860_v47  ;;  %v865_v43 = vld [vmem:[#allocation6 + $0x208] sm:$0xff]  ;;  %v867_v44 = vld [vmem:[#allocation6 + $0x218] sm:$0xff] }
 0x1c9   :  { %677 = vmatmul.mubr.f32.gmra.mrb[2].mxu1 %v2713_v17  ;;  %v881_v47 = vld [vmem:[#allocation6 + $0x288] sm:$0xff]  ;;  %v883_v41 = vld [vmem:[#allocation6 + $0x298] sm:$0xff] }
 0x1ca   :  { %1983 = vmatpush1.bf16.msra.mxu1 %v1982_v48  ;;  %1689 = vmatprep.mubr.msk.f32.mxu1 %vm111_vm1, %v314_v56  ;;  %v495_v48 = vld [vmem:[#allocation3 + $0x550] sm:$0xff]  ;;  %v502_v56 = vld [vmem:[#allocation3 + $0x588] sm:$0xff] }
 0x1cb   :  { %1985 = vmatprep.subr.bf16.mxu1 %v1984_v50  ;;  %v500_v50 = vld [vmem:[#allocation3 + $0x578] sm:$0xff]  ;;  %v2018_v51 = vpack.c.bf16 %v495_v48, %v493_v46 }
 0x1cc   :  { %v2020_v52 = vpack.c.bf16 %v500_v50, %v498_v49 }
 0x1ce   :  { %1987 = vmatpush1.bf16.msra.mxu1 %v1986_v57  ;;  %v504_v57 = vld [vmem:[#allocation3 + $0x598] sm:$0xff] }
 0x1cf   :  { %1989 = vmatprep.subr.bf16.mxu1 %v1988_v58  ;;  %v2022_v58 = vpack.c.bf16 %v499_v54, %v497_v3  ;;  %v2024_v59 = vpack.c.bf16 %v504_v57, %v502_v56  ;;  %v864_v57 = vld [vmem:[#allocation6 + $0x200] sm:$0xff] }
 0x1d2   :  { %1991 = vmatpush1.bf16.msra.mxu1 %v1990_v1  ;;  %v508_v1 = vld [vmem:[#allocation3 + $0x5b8] sm:$0xff] }
 0x1d3   :  { %1993 = vmatprep.subr.bf16.mxu1 %v1992_v9  ;;  %v2026_v9 = vpack.c.bf16 %v503_v61, %v501_v60  ;;  %v2028_v10 = vpack.c.bf16 %v508_v1, %v506_v0  ;;  %v869_v0 = vld [vmem:[#allocation6 + $0x228] sm:$0xff]  ;;  %v871_v1 = vld [vmem:[#allocation6 + $0x238] sm:$0xff] }
 0x1d6   :  { %1995 = vmatpush1.bf16.msra.mxu1 %v1994_v13  ;;  %v512_v13 = vld [vmem:[#allocation3 + $0x5d8] sm:$0xff] }
 0x1d7   :  { %1997 = vmatprep.subr.bf16.mxu1 %v1996_v14  ;;  %v2030_v14 = vpack.c.bf16 %v507_v2, %v505_v11  ;;  %v2032_v15 = vpack.c.bf16 %v512_v13, %v510_v12 }
 0x1da   :  { %1999 = vmatpush1.bf16.msra.mxu1 %v1998_v22  ;;  %v516_v22 = vld [vmem:[#allocation3 + $0x5f8] sm:$0xff] }
 0x1db   :  { %2001 = vmatprep.subr.bf16.mxu1 %v2000_v23  ;;  %v2034_v23 = vpack.c.bf16 %v511_v20, %v509_v18  ;;  %v2036_v24 = vpack.c.bf16 %v516_v22, %v514_v21  ;;  %v870_v18 = vld [vmem:[#allocation6 + $0x230] sm:$0xff]  ;;  %v873_v22 = vld [vmem:[#allocation6 + $0x248] sm:$0xff] }
 0x1de   :  { %2003 = vmatpush1.bf16.msra.mxu1 %v2002_v29  ;;  %v310_v29 = vrot.slane %v2713_v17, 1 }
 0x1df   :  { %2005 = vmatprep.subr.bf16.mxu1 %v2004_v30  ;;  %v309_v30 = vrot.slane %v2707_v62, 1 }
 0x1e0   :  { %v319_v35 = vsel %vm132_vm0, %v310_v29, 0.0 }
 0x1e1   :  { %v311_v33 = vsel %vm132_vm0, %v309_v30, %v310_v29  ;;  %v872_v29 = vld [vmem:[#allocation6 + $0x240] sm:$0xff]  ;;  %v874_v30 = vld [vmem:[#allocation6 + $0x250] sm:$0xff] }
 0x1e2   :  { %2007 = vmatpush1.bf16.msra.mxu1 %v2006_v4  ;;  %v859_v4 = vld [vmem:[#allocation6 + $0x1d8] sm:$0xff] }
 0x1e3   :  { %2009 = vmatprep.subr.bf16.mxu1 %v2008_v5  ;;  %v2096_v5 = vpack.c.bf16 %v859_v4, %v857_v37  ;;  %v2114_v37 = vpack.c.bf16 %v874_v30, %v872_v29  ;;  %v876_v4 = vld [vmem:[#allocation6 + $0x260] sm:$0xff] }
 0x1e4   :  { %v1304_v29 = vld [vmem:[%s3196_s7 + $0xc8] sm:$0xff] }
 0x1e5   :  { %2097 = vmatprep.subr.bf16.mxu0 %v2096_v5  ;;  %v1295_v5 = vld [vmem:[%s3196_s7 + $0x80] sm:$0xff] }
 0x1e6   :  { %2011 = vmatpush1.bf16.msra.mxu1 %v2010_v28  ;;  %2099 = vmatpush1.bf16.msra.mxu0 %v2098_v8  ;;  %v863_v28 = vld [vmem:[#allocation6 + $0x1f8] sm:$0xff]  ;;  %v878_v8 = vld [vmem:[#allocation6 + $0x270] sm:$0xff] }
 0x1e7   :  { %2013 = vmatprep.subr.bf16.mxu1 %v2012_v40  ;;  %v2100_v40 = vpack.c.bf16 %v863_v28, %v861_v39  ;;  %v2232_v39 = vpack.c.bf16 %v1296_v7, %v1295_v5  ;;  %v1279_v28 = vld [vmem:[%s3196_s7] sm:$0xff] }
 0x1e8   :  { %v895_v5 = vld [vmem:[#allocation6 + $0x2f8] sm:$0xff] }
 0x1e9   :  { %2101 = vmatprep.subr.bf16.mxu0 %v2100_v40  ;;  %v1280_v40 = vld [vmem:[%s3196_s7 + $0x8] sm:$0xff] }
 0x1ea   :  { %2015 = vmatpush1.bf16.msra.mxu1 %v2014_v45  ;;  %2103 = vmatpush1.bf16.msra.mxu0 %v2102_v42  ;;  %v2104_v45 = vpack.c.bf16 %v867_v44, %v865_v43  ;;  %v2234_v42 = vpack.c.bf16 %v1280_v40, %v1279_v28  ;;  %v1297_v43 = vld [vmem:[%s3196_s7 + $0x90] sm:$0xff]  ;;  %v1298_v44 = vld [vmem:[%s3196_s7 + $0x98] sm:$0xff]  ;;  %v892_v40 = vld [vmem:[#allocation6 + $0x2e0] sm:$0xff] }
 0x1eb   :  { %2017 = vmatprep.subr.bf16.mxu1 %v2016_v36  ;;  %v517_v36 = vld [vmem:[%s3193_s4] sm:$0x3] }
 0x1ec   :  { %2105 = vmatprep.subr.bf16.mxu0 %v2104_v45  ;;  %v522_v46 = vrot.slane %v517_v36, %v2697_v53  ;;  %v526_v48 = vrot.slane %v517_v36, %v2703_v55  ;;  %v1281_v45 = vld [vmem:[%s3196_s7 + $0x10] sm:$0xff]  ;;  %v2118_v36 = vpack.c.bf16 %v878_v8, %v876_v4 }
 0x1ed   :  { %v893_v4 = vld [vmem:[#allocation6 + $0x2e8] sm:$0xff] }
 0x1ee   :  { %2019 = vmatpush1.bf16.msra.mxu1 %v2018_v51  ;;  %v1305_v8 = vld [vmem:[%s3196_s7 + $0xd0] sm:$0xff]  ;;  %v2132_v28 = vpack.c.bf16 %v895_v5, %v893_v4  ;;  %v920_v4 = vld [vmem:[#allocation6 + $0x3c0] sm:$0xff] }
 0x1ef   :  { %2021 = vmatprep.subr.bf16.mxu1 %v2020_v52  ;;  %v922_v5 = vld [vmem:[#allocation6 + $0x3d0] sm:$0xff] }
 0x1f2   :  { %2023 = vmatpush1.bf16.msra.mxu1 %v2022_v58  ;;  %v866_v58 = vld [vmem:[#allocation6 + $0x210] sm:$0xff] }
 0x1f3   :  { %2025 = vmatprep.subr.bf16.mxu1 %v2024_v59  ;;  %v2106_v2 = vpack.c.bf16 %v866_v58, %v864_v57  ;;  %v1299_v58 = vld [vmem:[%s3196_s7 + $0xa0] sm:$0xff] }
 0x1f6   :  { %2027 = vmatpush1.bf16.msra.mxu1 %v2026_v9 }
 0x1f7   :  { %2029 = vmatprep.subr.bf16.mxu1 %v2028_v10 }
 0x1fa   :  { %2031 = vmatpush1.bf16.msra.mxu1 %v2030_v14  ;;  %v2108_v14 = vpack.c.bf16 %v871_v1, %v869_v0 }
 0x1fb   :  { %2033 = vmatprep.subr.bf16.mxu1 %v2032_v15  ;;  %v868_v15 = vld [vmem:[#allocation6 + $0x220] sm:$0xff] }
 0x1fc   :  { %v2110_v25 = vpack.c.bf16 %v870_v18, %v868_v15  ;;  %v886_v15 = vld [vmem:[#allocation6 + $0x2b0] sm:$0xff] }
 0x1fe   :  { %2035 = vmatpush1.bf16.msra.mxu1 %v2034_v23  ;;  %v875_v23 = vld [vmem:[#allocation6 + $0x258] sm:$0xff] }
 0x1ff   :  { %2037 = vmatprep.subr.bf16.mxu1 %v2036_v24 }
 0x202   :  { %2039 = vmatpush1.bf16.msra.mxu1 %v2038_v27  ;;  %v2112_v27 = vpack.c.bf16 %v875_v23, %v873_v22  ;;  %v889_v22 = vld [vmem:[#allocation6 + $0x2c8] sm:$0xff]  ;;  %v891_v23 = vld [vmem:[#allocation6 + $0x2d8] sm:$0xff] }
 0x203   :  { %2233 = vmatprep.subr.bf16.mxu1 %v2232_v39  ;;  %v2128_v30 = vpack.c.bf16 %v891_v23, %v889_v22  ;;  %v1306_v39 = vld [vmem:[%s3196_s7 + $0xd8] sm:$0xff]  ;;  %v912_v22 = vld [vmem:[#allocation6 + $0x380] sm:$0xff] }
 0x204   :  { %v914_v23 = vld [vmem:[#allocation6 + $0x390] sm:$0xff] }
 0x205   :  { %1690 = vmatmul.mubr.msk.f32.vlgmr.msra.gmra.mrb[0].mxu1 %vm111_vm1, %v311_v33 }
 0x206   :  { %1691 = vmatprep.mubr.msk.f32.mxu1 %vm112_vm2, %v320_v34  ;;  %v877_v34 = vld [vmem:[#allocation6 + $0x268] sm:$0xff]  ;;  %2235 = vmatpush3.bf16.msra.mxu1 %v2234_v42 }
 0x207   :  { %v897_v42 = vld [vmem:[#allocation6 + $0x308] sm:$0xff] }
 0x209   :  { %1692 = vmatmul.mubr.msk.f32.gmra.mrb[2].mxu1 %vm112_vm2, %v319_v35  ;;  %v879_v35 = vld [vmem:[#allocation6 + $0x278] sm:$0xff] }
 0x20a   :  { %v2116_v38 = vpack.c.bf16 %v879_v35, %v877_v34  ;;  %v1287_v35 = vld [vmem:[%s3196_s7 + $0x40] sm:$0xff] }
 0x2d8   :  { %v749_v49 = vpop.f32.mrb[0].mxu1 }
 0x2d9   :  { %v2328_v50 = vadd.f32 %v749_v49, %v522_v46  ;;  %v751_v51 = vpop.f32.mrb[1].mxu1  ;;  %v2236_v49 = vpack.c.bf16 %v1298_v44, %v1297_v43  ;;  %v899_v43 = vld [vmem:[#allocation6 + $0x318] sm:$0xff] }
 0x2da   :  { %v2329_v52 = vadd.f32 %v751_v51, %v526_v48  ;;  %v2120_v51 = vpack.c.bf16 %v883_v41, %v881_v47  ;;  %v894_v47 = vld [vmem:[#allocation6 + $0x2f0] sm:$0xff]  ;;  %v2252_v41 = vpack.c.bf16 %v1306_v39, %v1305_v8  ;;  %v2162_v8 = vpack.c.bf16 %v922_v5, %v920_v4  ;;  %v952_v4 = vld [vmem:[#allocation6 + $0x4c0] sm:$0xff] }
 0x2db   :  { %v2760_v3 = vmax.f32 %v2328_v50, 0.0  ;;  %v1282_v50 = vld [vmem:[%s3196_s7 + $0x18] sm:$0xff]  ;;  %2237 = vmatprep.subr.bf16.mxu1 %v2236_v49  ;;  %v2134_v44 = vpack.c.bf16 %v894_v47, %v892_v40  ;;  %v929_v47 = vld [vmem:[#allocation6 + $0x408] sm:$0xff] }
 0x2dc   :  { %v2762_v54 = vmax.f32 %v2329_v52, 0.0  ;;  %v755_v56 = vpop.f32.mrb[2].mxu1  ;;  %v885_v52 = vld [vmem:[#allocation6 + $0x2a8] sm:$0xff]  ;;  %v2238_v57 = vpack.c.bf16 %v1282_v50, %v1281_v45  ;;  %v2136_v45 = vpack.c.bf16 %v899_v43, %v897_v42  ;;  %v903_v49 = vld [vmem:[#allocation6 + $0x338] sm:$0xff]  ;;  %v926_v40 = vld [vmem:[#allocation6 + $0x3f0] sm:$0xff] }
 0x2dd   :  { %v768_v59 = vrot.slane %v2760_v3, 7  ;;  %v2330_v60 = vadd.f32 %v755_v56, %v522_v46  ;;  %v757_v61 = vpop.f32.mrb[3].mxu1  ;;  %v880_v46 = vld [vmem:[#allocation6 + $0x280] sm:$0xff]  ;;  %v887_v56 = vld [vmem:[#allocation6 + $0x2b8] sm:$0xff]  ;;  %v954_v5 = vld [vmem:[#allocation6 + $0x4d0] sm:$0xff] }
 0x2de   :  { %v2331_v9 = vadd.f32 %v757_v61, %v526_v48  ;;  %v769_v10 = vrot.slane %v2762_v54, 7  ;;  %v882_v48 = vld [vmem:[#allocation6 + $0x290] sm:$0xff]  ;;  %v1284_v61 = vld [vmem:[%s3196_s7 + $0x28] sm:$0xff]  ;;  %2239 = vmatpush3.bf16.msra.mxu1 %v2238_v57 }
 0x2df   :  { %v2766_v11 = vmax.f32 %v2330_v60, 0.0  ;;  %v778_v20 = vsel %vm119_vm3, 0.0, %v768_v59  ;;  %v1283_v60 = vld [vmem:[%s3196_s7 + $0x20] sm:$0xff]  ;;  %v2122_v1 = vpack.c.bf16 %v882_v48, %v880_v46  ;;  %v898_v46 = vld [vmem:[#allocation6 + $0x310] sm:$0xff]  ;;  %v901_v48 = vld [vmem:[#allocation6 + $0x328] sm:$0xff] }
 0x2e0   :  { %v2768_v12 = vmax.f32 %v2331_v9, 0.0  ;;  %v779_v13 = vsel %vm119_vm3, 0.0, %v769_v10  ;;  %v884_v9 = vld [vmem:[#allocation6 + $0x2a0] sm:$0xff]  ;;  %v905_v57 = vld [vmem:[#allocation6 + $0x348] sm:$0xff] }
 0x2e1   :  { %v770_v21 = vrot.slane %v2766_v11, 7  ;;  %1693 = vmatprep.mubr.msk.f32.mxu0 %vm101_vm4, %v779_v13  ;;  %v1302_v13 = vld [vmem:[%s3196_s7 + $0xb8] sm:$0xff] }
 0x2e2   :  { %v772_v24 = vrot.slane %v2768_v12, 7  ;;  %1694 = vmatmul.mubr.msk.f32.vlgmr.msra.gmra.mrb[4].mxu0 %vm101_vm4, %v778_v20  ;;  %v1285_v20 = vld [vmem:[%s3196_s7 + $0x30] sm:$0xff] }
 0x2e3   :  { %2107 = vmatpush1.bf16.msra.mxu0 %v2106_v2  ;;  %v771_v33 = vsel %vm119_vm3, %v768_v59, %v770_v21  ;;  %v1300_v59 = vld [vmem:[%s3196_s7 + $0xa8] sm:$0xff]  ;;  %v1301_v2 = vld [vmem:[%s3196_s7 + $0xb0] sm:$0xff]  ;;  %v1286_v21 = vld [vmem:[%s3196_s7 + $0x38] sm:$0xff] }
 0x2e4   :  { %v773_v26 = vsel %vm119_vm3, %v769_v10, %v772_v24  ;;  %2109 = vmatprep.subr.bf16.mxu0 %v2108_v14  ;;  %v2240_v0 = vpack.c.bf16 %v1300_v59, %v1299_v58  ;;  %v2242_v10 = vpack.c.bf16 %v1284_v61, %v1283_v60  ;;  %v2124_v14 = vpack.c.bf16 %v887_v56, %v885_v52  ;;  %v900_v52 = vld [vmem:[#allocation6 + $0x320] sm:$0xff]  ;;  %v902_v56 = vld [vmem:[#allocation6 + $0x330] sm:$0xff]  ;;  %v907_v58 = vld [vmem:[#allocation6 + $0x358] sm:$0xff] }
 0x2e5   :  { %1695 = vmatprep.mubr.msk.f32.mxu0 %vm102_vm5, %v773_v26  ;;  %v2244_v18 = vpack.c.bf16 %v1302_v13, %v1301_v2  ;;  %v2126_v24 = vpack.c.bf16 %v886_v15, %v884_v9  ;;  %v2246_v26 = vpack.c.bf16 %v1286_v21, %v1285_v20  ;;  %v2142_v59 = vpack.c.bf16 %v902_v56, %v900_v52  ;;  %v904_v61 = vld [vmem:[#allocation6 + $0x340] sm:$0xff]  ;;  %v911_v9 = vld [vmem:[#allocation6 + $0x378] sm:$0xff]  ;;  %v913_v15 = vld [vmem:[#allocation6 + $0x388] sm:$0xff] }
 0x2e6   :  { %1696 = vmatmul.mubr.msk.f32.gmra.mrb[6].mxu0 %vm102_vm5, %v771_v33  ;;  %2241 = vmatprep.subr.bf16.mxu1 %v2240_v0  ;;  %v890_v33 = vld [vmem:[#allocation6 + $0x2d0] sm:$0xff]  ;;  %v2144_v60 = vpack.c.bf16 %v907_v58, %v905_v57  ;;  %v908_v13 = vld [vmem:[#allocation6 + $0x360] sm:$0xff]  ;;  %v937_v52 = vld [vmem:[#allocation6 + $0x448] sm:$0xff]  ;;  %v788_v57 = vrot.slane %v2768_v12, 1 }
 0x2e7   :  { %2111 = vmatpush1.bf16.msra.mxu0 %v2110_v25  ;;  %1145 = vmatprep.mubr.f32.mxu0 %v2762_v54  ;;  %v888_v25 = vld [vmem:[#allocation6 + $0x2c0] sm:$0xff]  ;;  %v906_v0 = vld [vmem:[#allocation6 + $0x350] sm:$0xff]  ;;  %v939_v56 = vld [vmem:[#allocation6 + $0x458] sm:$0xff] }
 0x2e8   :  { %2113 = vmatprep.subr.bf16.mxu0 %v2112_v27  ;;  %2243 = vmatpush3.bf16.msra.mxu1 %v2242_v10  ;;  %v1303_v27 = vld [vmem:[%s3196_s7 + $0xc0] sm:$0xff]  ;;  %v2130_v7 = vpack.c.bf16 %v890_v33, %v888_v25  ;;  %v2146_v10 = vpack.c.bf16 %v906_v0, %v904_v61  ;;  %v921_v33 = vld [vmem:[#allocation6 + $0x3c8] sm:$0xff]  ;;  %v938_v0 = vld [vmem:[#allocation6 + $0x450] sm:$0xff] }
 0x2e9   :  { %2245 = vmatprep.subr.bf16.mxu1 %v2244_v18  ;;  %v2248_v34 = vpack.c.bf16 %v1304_v29, %v1303_v27  ;;  %v915_v18 = vld [vmem:[#allocation6 + $0x398] sm:$0xff]  ;;  %v916_v29 = vld [vmem:[#allocation6 + $0x3a0] sm:$0xff] }
 0x2ea   :  { %v2152_v21 = vpack.c.bf16 %v915_v18, %v913_v15  ;;  %v919_v25 = vld [vmem:[#allocation6 + $0x3b8] sm:$0xff]  ;;  %v936_v61 = vld [vmem:[#allocation6 + $0x440] sm:$0xff]  ;;  %v945_v15 = vld [vmem:[#allocation6 + $0x488] sm:$0xff] }
 0x2eb   :  { %2115 = vmatpush1.bf16.msra.mxu0 %v2114_v37  ;;  %v1288_v37 = vld [vmem:[%s3196_s7 + $0x48] sm:$0xff]  ;;  %v947_v18 = vld [vmem:[#allocation6 + $0x498] sm:$0xff] }
 0x2ec   :  { %2117 = vmatprep.subr.bf16.mxu0 %v2116_v38  ;;  %2247 = vmatpush3.bf16.msra.mxu1 %v2246_v26  ;;  %v2250_v38 = vpack.c.bf16 %v1288_v37, %v1287_v35  ;;  %v2154_v26 = vpack.c.bf16 %v914_v23, %v912_v22  ;;  %v944_v22 = vld [vmem:[#allocation6 + $0x480] sm:$0xff]  ;;  %v946_v23 = vld [vmem:[#allocation6 + $0x490] sm:$0xff] }
 0x2ed   :  { %2249 = vmatprep.subr.bf16.mxu1 %v2248_v34  ;;  %v923_v34 = vld [vmem:[#allocation6 + $0x3d8] sm:$0xff] }
 0x2ee   :  { %v2160_v37 = vpack.c.bf16 %v923_v34, %v921_v33  ;;  %v953_v33 = vld [vmem:[#allocation6 + $0x4c8] sm:$0xff]  ;;  %v955_v34 = vld [vmem:[#allocation6 + $0x4d8] sm:$0xff] }
 0x2ef   :  { %2119 = vmatpush1.bf16.msra.mxu0 %v2118_v36  ;;  %v896_v36 = vld [vmem:[#allocation6 + $0x300] sm:$0xff] }
 0x2f0   :  { %2121 = vmatprep.subr.bf16.mxu0 %v2120_v51  ;;  %2251 = vmatpush3.bf16.msra.mxu1 %v2250_v38  ;;  %v2138_v50 = vpack.c.bf16 %v898_v46, %v896_v36  ;;  %v2140_v51 = vpack.c.bf16 %v903_v49, %v901_v48  ;;  %v927_v38 = vld [vmem:[#allocation6 + $0x3f8] sm:$0xff]  ;;  %v933_v36 = vld [vmem:[#allocation6 + $0x428] sm:$0xff] }
 0x2f1   :  { %2253 = vmatprep.subr.bf16.mxu1 %v2252_v41  ;;  %v931_v41 = vld [vmem:[#allocation6 + $0x418] sm:$0xff] }
 0x2f2   :  { %v2168_v43 = vpack.c.bf16 %v931_v41, %v929_v47  ;;  %v935_v46 = vld [vmem:[#allocation6 + $0x438] sm:$0xff]  ;;  %v961_v47 = vld [vmem:[#allocation6 + $0x508] sm:$0xff] }
 0x2f3   :  { %2123 = vmatpush1.bf16.msra.mxu0 %v2122_v1  ;;  %v909_v1 = vld [vmem:[#allocation6 + $0x368] sm:$0xff]  ;;  %v2172_v49 = vpack.c.bf16 %v935_v46, %v933_v36  ;;  %v963_v41 = vld [vmem:[#allocation6 + $0x518] sm:$0xff] }
 0x2f4   :  { %2125 = vmatprep.subr.bf16.mxu0 %v2124_v14  ;;  %v2148_v2 = vpack.c.bf16 %v911_v9, %v909_v1  ;;  %v910_v14 = vld [vmem:[#allocation6 + $0x370] sm:$0xff]  ;;  %v941_v1 = vld [vmem:[#allocation6 + $0x468] sm:$0xff]  ;;  %v943_v9 = vld [vmem:[#allocation6 + $0x478] sm:$0xff] }
 0x2f5   :  { %v2150_v20 = vpack.c.bf16 %v910_v14, %v908_v13  ;;  %v2180_v13 = vpack.c.bf16 %v943_v9, %v941_v1  ;;  %v942_v14 = vld [vmem:[#allocation6 + $0x470] sm:$0xff]  ;;  %v965_v36 = vld [vmem:[#allocation6 + $0x528] sm:$0xff]  ;;  %v967_v46 = vld [vmem:[#allocation6 + $0x538] sm:$0xff] }
 0x2f6   :  { %v975_v1 = vld [vmem:[#allocation6 + $0x578] sm:$0xff] }
 0x2f7   :  { %2127 = vmatpush1.bf16.msra.mxu0 %v2126_v24  ;;  %v917_v24 = vld [vmem:[#allocation6 + $0x3a8] sm:$0xff] }
 0x2f8   :  { %2129 = vmatprep.subr.bf16.mxu0 %v2128_v30  ;;  %v2156_v27 = vpack.c.bf16 %v919_v25, %v917_v24  ;;  %v918_v30 = vld [vmem:[#allocation6 + $0x3b0] sm:$0xff]  ;;  %v949_v24 = vld [vmem:[#allocation6 + $0x4a8] sm:$0xff]  ;;  %v951_v25 = vld [vmem:[#allocation6 + $0x4b8] sm:$0xff] }
 0x2f9   :  { %v2158_v35 = vpack.c.bf16 %v918_v30, %v916_v29  ;;  %v948_v29 = vld [vmem:[#allocation6 + $0x4a0] sm:$0xff]  ;;  %v950_v30 = vld [vmem:[#allocation6 + $0x4b0] sm:$0xff] }
 0x2fb   :  { %2131 = vmatpush1.bf16.msra.mxu0 %v2130_v7  ;;  %v925_v7 = vld [vmem:[#allocation6 + $0x3e8] sm:$0xff] }
 0x2fc   :  { %2133 = vmatprep.subr.bf16.mxu0 %v2132_v28  ;;  %v2164_v39 = vpack.c.bf16 %v927_v38, %v925_v7  ;;  %v924_v28 = vld [vmem:[#allocation6 + $0x3e0] sm:$0xff]  ;;  %v957_v7 = vld [vmem:[#allocation6 + $0x4e8] sm:$0xff]  ;;  %v959_v38 = vld [vmem:[#allocation6 + $0x4f8] sm:$0xff] }
 0x2fd   :  { %v2166_v42 = vpack.c.bf16 %v926_v40, %v924_v28  ;;  %v956_v28 = vld [vmem:[#allocation6 + $0x4e0] sm:$0xff]  ;;  %v958_v40 = vld [vmem:[#allocation6 + $0x4f0] sm:$0xff] }
 0x2ff   :  { %2135 = vmatpush1.bf16.msra.mxu0 %v2134_v44  ;;  %v928_v44 = vld [vmem:[#allocation6 + $0x400] sm:$0xff] }
 0x300   :  { %2137 = vmatprep.subr.bf16.mxu0 %v2136_v45  ;;  %v930_v45 = vld [vmem:[#allocation6 + $0x410] sm:$0xff] }
 0x301   :  { %v2170_v48 = vpack.c.bf16 %v930_v45, %v928_v44  ;;  %v960_v44 = vld [vmem:[#allocation6 + $0x500] sm:$0xff]  ;;  %v962_v45 = vld [vmem:[#allocation6 + $0x510] sm:$0xff] }
 0x303   :  { %2139 = vmatpush1.bf16.msra.mxu0 %v2138_v50  ;;  %v932_v50 = vld [vmem:[#allocation6 + $0x420] sm:$0xff] }
 0x304   :  { %2141 = vmatprep.subr.bf16.mxu0 %v2140_v51  ;;  %v934_v51 = vld [vmem:[#allocation6 + $0x430] sm:$0xff] }
 0x305   :  { %v2174_v58 = vpack.c.bf16 %v934_v51, %v932_v50  ;;  %v964_v50 = vld [vmem:[#allocation6 + $0x520] sm:$0xff]  ;;  %v966_v51 = vld [vmem:[#allocation6 + $0x530] sm:$0xff] }
 0x307   :  { %2143 = vmatpush1.bf16.msra.mxu0 %v2142_v59  ;;  %v787_v59 = vrot.slane %v2762_v54, 1  ;;  %v940_v54 = vld [vmem:[#allocation6 + $0x460] sm:$0xff] }
 0x308   :  { %2145 = vmatprep.subr.bf16.mxu0 %v2144_v60  ;;  %v2176_v60 = vpack.c.bf16 %v939_v56, %v937_v52  ;;  %v969_v52 = vld [vmem:[#allocation6 + $0x548] sm:$0xff]  ;;  %v971_v56 = vld [vmem:[#allocation6 + $0x558] sm:$0xff] }
 0x30b   :  { %2147 = vmatpush1.bf16.msra.mxu0 %v2146_v10  ;;  %v789_v10 = vsel %vm132_vm0, %v787_v59, %v788_v57  ;;  %v2208_v59 = vpack.c.bf16 %v971_v56, %v969_v52  ;;  %v1331_v52 = vld [vmem:[%s3196_s7 + $0x1a0] sm:$0xff]  ;;  %v795_v56 = vsel %vm132_vm0, %v788_v57, 0.0  ;;  %v1334_v57 = vld [vmem:[%s3196_s7 + $0x1b8] sm:$0xff] }
 0x30c   :  { %2149 = vmatprep.subr.bf16.mxu0 %v2148_v2  ;;  %v2178_v2 = vpack.c.bf16 %v938_v0, %v936_v61  ;;  %v970_v61 = vld [vmem:[#allocation6 + $0x550] sm:$0xff]  ;;  %v973_v0 = vld [vmem:[#allocation6 + $0x568] sm:$0xff] }
 0x30f   :  { %2151 = vmatpush1.bf16.msra.mxu0 %v2150_v20  ;;  %v2182_v20 = vpack.c.bf16 %v942_v14, %v940_v54  ;;  %v977_v54 = vld [vmem:[#allocation6 + $0x588] sm:$0xff]  ;;  %v979_v14 = vld [vmem:[#allocation6 + $0x598] sm:$0xff] }
 0x310   :  { %2153 = vmatprep.subr.bf16.mxu0 %v2152_v21  ;;  %v2184_v21 = vpack.c.bf16 %v947_v18, %v945_v15  ;;  %v2216_v18 = vpack.c.bf16 %v979_v14, %v977_v54  ;;  %v1336_v54 = vld [vmem:[%s3196_s7 + $0x1c8] sm:$0xff] }
 0x313   :  { %2155 = vmatpush1.bf16.msra.mxu0 %v2154_v26  ;;  %v2186_v26 = vpack.c.bf16 %v946_v23, %v944_v22  ;;  %v981_v22 = vld [vmem:[#allocation6 + $0x5a8] sm:$0xff]  ;;  %v983_v23 = vld [vmem:[#allocation6 + $0x5b8] sm:$0xff] }
 0x314   :  { %2157 = vmatprep.subr.bf16.mxu0 %v2156_v27  ;;  %v2188_v27 = vpack.c.bf16 %v951_v25, %v949_v24  ;;  %v2220_v25 = vpack.c.bf16 %v983_v23, %v981_v22  ;;  %v1338_v22 = vld [vmem:[%s3196_s7 + $0x1d8] sm:$0xff] }
 0x317   :  { %2159 = vmatpush1.bf16.msra.mxu0 %v2158_v35  ;;  %v2190_v35 = vpack.c.bf16 %v950_v30, %v948_v29  ;;  %v985_v29 = vld [vmem:[#allocation6 + $0x5c8] sm:$0xff]  ;;  %v987_v30 = vld [vmem:[#allocation6 + $0x5d8] sm:$0xff] }
 0x318   :  { %2161 = vmatprep.subr.bf16.mxu0 %v2160_v37  ;;  %v2192_v37 = vpack.c.bf16 %v955_v34, %v953_v33  ;;  %v2224_v34 = vpack.c.bf16 %v987_v30, %v985_v29  ;;  %v1289_v29 = vld [vmem:[%s3196_s7 + $0x50] sm:$0xff]  ;;  %v1290_v30 = vld [vmem:[%s3196_s7 + $0x58] sm:$0xff] }
 0x31b   :  { %2163 = vmatpush1.bf16.msra.mxu0 %v2162_v8  ;;  %v2194_v8 = vpack.c.bf16 %v954_v5, %v952_v4  ;;  %v989_v4 = vld [vmem:[#allocation6 + $0x5e8] sm:$0xff]  ;;  %v991_v5 = vld [vmem:[#allocation6 + $0x5f8] sm:$0xff] }
 0x31c   :  { %2165 = vmatprep.subr.bf16.mxu0 %v2164_v39  ;;  %v2196_v39 = vpack.c.bf16 %v959_v38, %v957_v7  ;;  %v2228_v38 = vpack.c.bf16 %v991_v5, %v989_v4  ;;  %v1323_v4 = vld [vmem:[%s3196_s7 + $0x160] sm:$0xff]  ;;  %v1324_v5 = vld [vmem:[%s3196_s7 + $0x168] sm:$0xff] }
 0x31f   :  { %2167 = vmatpush1.bf16.msra.mxu0 %v2166_v42  ;;  %v2198_v42 = vpack.c.bf16 %v958_v40, %v956_v28  ;;  %v1327_v28 = vld [vmem:[%s3196_s7 + $0x180] sm:$0xff]  ;;  %v1328_v40 = vld [vmem:[%s3196_s7 + $0x188] sm:$0xff] }
 0x320   :  { %2169 = vmatprep.subr.bf16.mxu0 %v2168_v43  ;;  %v2200_v43 = vpack.c.bf16 %v963_v41, %v961_v47  ;;  %v2264_v41 = vpack.c.bf16 %v1328_v40, %v1327_v28  ;;  %v1291_v28 = vld [vmem:[%s3196_s7 + $0x60] sm:$0xff]  ;;  %v1292_v40 = vld [vmem:[%s3196_s7 + $0x68] sm:$0xff] }
 0x322   :  { %1146 = vmatmul.mubr.f32.vlgmr.msra.gmra.mrb[4].mxu0 %v2760_v3 }
 0x323   :  { %1151 = vmatprep.mubr.f32.mxu0 %v2768_v12  ;;  %2171 = vmatpush1.bf16.msra.mxu0 %v2170_v48  ;;  %v2202_v48 = vpack.c.bf16 %v962_v45, %v960_v44  ;;  %v785_v44 = vrot.slane %v2766_v11, 1  ;;  %v1329_v45 = vld [vmem:[%s3196_s7 + $0x190] sm:$0xff] }
 0x324   :  { %2173 = vmatprep.subr.bf16.mxu0 %v2172_v49  ;;  %v2204_v49 = vpack.c.bf16 %v967_v46, %v965_v36  ;;  %v1330_v36 = vld [vmem:[%s3196_s7 + $0x198] sm:$0xff]  ;;  %v784_v46 = vrot.slane %v2760_v3, 1  ;;  %v1332_v3 = vld [vmem:[%s3196_s7 + $0x1a8] sm:$0xff]  ;;  %v1333_v12 = vld [vmem:[%s3196_s7 + $0x1b0] sm:$0xff] }
 0x326   :  { %1152 = vmatmul.mubr.f32.gmra.mrb[6].mxu0 %v2766_v11  ;;  %v1314_v11 = vld [vmem:[%s3196_s7 + $0x118] sm:$0xff] }
 0x327   :  { %2175 = vmatpush1.bf16.msra.mxu0 %v2174_v58  ;;  %1697 = vmatprep.mubr.msk.f32.mxu0 %vm111_vm1, %v789_v10  ;;  %v2206_v58 = vpack.c.bf16 %v966_v51, %v964_v50  ;;  %v2212_v10 = vpack.c.bf16 %v975_v1, %v973_v0  ;;  %v1313_v50 = vld [vmem:[%s3196_s7 + $0x110] sm:$0xff]  ;;  %v786_v51 = vsel %vm132_vm0, %v784_v46, %v785_v44  ;;  %v794_v0 = vsel %vm132_vm0, %v785_v44, 0.0 }
 0x328   :  { %2177 = vmatprep.subr.bf16.mxu0 %v2176_v60  ;;  %v968_v60 = vld [vmem:[#allocation6 + $0x540] sm:$0xff]  ;;  %v1325_v44 = vld [vmem:[%s3196_s7 + $0x170] sm:$0xff] }
 0x329   :  { %v2210_v9 = vpack.c.bf16 %v970_v61, %v968_v60  ;;  %v1315_v60 = vld [vmem:[%s3196_s7 + $0x120] sm:$0xff]  ;;  %v1316_v61 = vld [vmem:[%s3196_s7 + $0x128] sm:$0xff]  ;;  %v1309_v46 = vld [vmem:[%s3196_s7 + $0xf0] sm:$0xff] }
 0x32a   :  { %v2274_v1 = vpack.c.bf16 %v1316_v61, %v1315_v60 }
 0x32b   :  { %2179 = vmatpush1.bf16.msra.mxu0 %v2178_v2  ;;  %v972_v2 = vld [vmem:[#allocation6 + $0x560] sm:$0xff] }
 0x32c   :  { %2181 = vmatprep.subr.bf16.mxu0 %v2180_v13  ;;  %v974_v13 = vld [vmem:[#allocation6 + $0x570] sm:$0xff] }
 0x32d   :  { %v2214_v15 = vpack.c.bf16 %v974_v13, %v972_v2  ;;  %v1318_v2 = vld [vmem:[%s3196_s7 + $0x138] sm:$0xff]  ;;  %v1335_v13 = vld [vmem:[%s3196_s7 + $0x1c0] sm:$0xff] }
 0x32f   :  { %2183 = vmatpush1.bf16.msra.mxu0 %v2182_v20  ;;  %v976_v20 = vld [vmem:[#allocation6 + $0x580] sm:$0xff] }
 0x330   :  { %2185 = vmatprep.subr.bf16.mxu0 %v2184_v21  ;;  %v978_v21 = vld [vmem:[#allocation6 + $0x590] sm:$0xff] }
 0x331   :  { %v2218_v24 = vpack.c.bf16 %v978_v21, %v976_v20  ;;  %v1320_v20 = vld [vmem:[%s3196_s7 + $0x148] sm:$0xff]  ;;  %v1337_v21 = vld [vmem:[%s3196_s7 + $0x1d0] sm:$0xff] }
 0x333   :  { %2187 = vmatpush1.bf16.msra.mxu0 %v2186_v26  ;;  %v980_v26 = vld [vmem:[#allocation6 + $0x5a0] sm:$0xff] }
 0x334   :  { %2189 = vmatprep.subr.bf16.mxu0 %v2188_v27  ;;  %v982_v27 = vld [vmem:[#allocation6 + $0x5b0] sm:$0xff] }
 0x335   :  { %v2222_v33 = vpack.c.bf16 %v982_v27, %v980_v26  ;;  %v1322_v26 = vld [vmem:[%s3196_s7 + $0x158] sm:$0xff] }
 0x337   :  { %2191 = vmatpush1.bf16.msra.mxu0 %v2190_v35  ;;  %v984_v35 = vld [vmem:[#allocation6 + $0x5c0] sm:$0xff] }
 0x338   :  { %2193 = vmatprep.subr.bf16.mxu0 %v2192_v37  ;;  %v986_v37 = vld [vmem:[#allocation6 + $0x5d0] sm:$0xff] }
 0x339   :  { %v2226_v7 = vpack.c.bf16 %v986_v37, %v984_v35  ;;  %v1340_v35 = vld [vmem:[%s3196_s7 + $0x1e8] sm:$0xff] }
 0x33b   :  { %2195 = vmatpush1.bf16.msra.mxu0 %v2194_v8  ;;  %v988_v8 = vld [vmem:[#allocation6 + $0x5e0] sm:$0xff] }
 0x33c   :  { %2197 = vmatprep.subr.bf16.mxu0 %v2196_v39  ;;  %v990_v39 = vld [vmem:[#allocation6 + $0x5f0] sm:$0xff] }
 0x33d   :  { %v2230_v47 = vpack.c.bf16 %v990_v39, %v988_v8  ;;  %v1308_v8 = vld [vmem:[%s3196_s7 + $0xe8] sm:$0xff] }
 0x33f   :  { %2199 = vmatpush1.bf16.msra.mxu0 %v2198_v42  ;;  %v1311_v42 = vld [vmem:[%s3196_s7 + $0x100] sm:$0xff] }
 0x340   :  { %2201 = vmatprep.subr.bf16.mxu0 %v2200_v43  ;;  %v1312_v43 = vld [vmem:[%s3196_s7 + $0x108] sm:$0xff] }
 0x343   :  { %2203 = vmatpush1.bf16.msra.mxu0 %v2202_v48  ;;  %v2266_v48 = vpack.c.bf16 %v1312_v43, %v1311_v42  ;;  %v1342_v42 = vld [vmem:[%s3196_s7 + $0x1f8] sm:$0xff] }
 0x344   :  { %2205 = vmatprep.subr.bf16.mxu0 %v2204_v49  ;;  %v2268_v49 = vpack.c.bf16 %v1330_v36, %v1329_v45  ;;  %v1326_v45 = vld [vmem:[%s3196_s7 + $0x178] sm:$0xff] }
 0x345   :  { %v2294_v36 = vpack.c.bf16 %v1326_v45, %v1325_v44 }
 0x347   :  { %2207 = vmatpush1.bf16.msra.mxu0 %v2206_v58  ;;  %v2270_v58 = vpack.c.bf16 %v1314_v11, %v1313_v50  ;;  %v1293_v50 = vld [vmem:[%s3196_s7 + $0x70] sm:$0xff]  ;;  %v1294_v11 = vld [vmem:[%s3196_s7 + $0x78] sm:$0xff] }
 0x348   :  { %2209 = vmatprep.subr.bf16.mxu0 %v2208_v59  ;;  %v2272_v59 = vpack.c.bf16 %v1332_v3, %v1331_v52  ;;  %v1359_v52 = vld [vmem:[%s3196_s7 + $0x280] sm:$0xff]  ;;  %v1360_v3 = vld [vmem:[%s3196_s7 + $0x288] sm:$0xff] }
 0x34b   :  { %2211 = vmatpush1.bf16.msra.mxu0 %v2210_v9  ;;  %v2276_v9 = vpack.c.bf16 %v1334_v57, %v1333_v12 }
 0x34c   :  { %2213 = vmatprep.subr.bf16.mxu0 %v2212_v10  ;;  %v1317_v10 = vld [vmem:[%s3196_s7 + $0x130] sm:$0xff] }
 0x34d   :  { %v2278_v14 = vpack.c.bf16 %v1318_v2, %v1317_v10 }
 0x34f   :  { %2215 = vmatpush1.bf16.msra.mxu0 %v2214_v15  ;;  %v2280_v15 = vpack.c.bf16 %v1336_v54, %v1335_v13  ;;  %v1610_v13 = vld [vmem:[%s3198_s9] sm:$0xff]  ;;  %v1611_v54 = vld [vmem:[%s3198_s9 + $0x8] sm:$0xff] }
 0x350   :  { %2217 = vmatprep.subr.bf16.mxu0 %v2216_v18  ;;  %v1319_v18 = vld [vmem:[%s3196_s7 + $0x140] sm:$0xff] }
 0x351   :  { %v2282_v23 = vpack.c.bf16 %v1320_v20, %v1319_v18  ;;  %v1343_v18 = vld [vmem:[%s3196_s7 + $0x200] sm:$0xff] }
 0x353   :  { %2219 = vmatpush1.bf16.msra.mxu0 %v2218_v24  ;;  %v2284_v24 = vpack.c.bf16 %v1338_v22, %v1337_v21  ;;  %v1362_v22 = vld [vmem:[%s3196_s7 + $0x298] sm:$0xff] }
 0x354   :  { %2221 = vmatprep.subr.bf16.mxu0 %v2220_v25  ;;  %v1321_v25 = vld [vmem:[%s3196_s7 + $0x150] sm:$0xff] }
 0x355   :  { %v2286_v27 = vpack.c.bf16 %v1322_v26, %v1321_v25 }
 0x357   :  { %2223 = vmatpush1.bf16.msra.mxu0 %v2222_v33  ;;  %v2254_v33 = vpack.c.bf16 %v1290_v30, %v1289_v29 }
 0x358   :  { %2225 = vmatprep.subr.bf16.mxu0 %v2224_v34  ;;  %v1339_v34 = vld [vmem:[%s3196_s7 + $0x1e0] sm:$0xff] }
 0x359   :  { %v2288_v37 = vpack.c.bf16 %v1340_v35, %v1339_v34  ;;  %2255 = vmatpush3.bf16.msra.mxu1 %v2254_v33  ;;  %v1612_v34 = vld [vmem:[%s3198_s9 + $0x10] sm:$0xff] }
 0x35b   :  { %2227 = vmatpush1.bf16.msra.mxu0 %v2226_v7  ;;  %v2290_v7 = vpack.c.bf16 %v1324_v5, %v1323_v4 }
 0x35c   :  { %2229 = vmatprep.subr.bf16.mxu0 %v2228_v38  ;;  %v1307_v38 = vld [vmem:[%s3196_s7 + $0xe0] sm:$0xff] }
 0x35d   :  { %v2256_v39 = vpack.c.bf16 %v1308_v8, %v1307_v38 }
 0x35f   :  { %2231 = vmatpush1.bf16.msra.mxu0 %v2230_v47  ;;  %v2258_v47 = vpack.c.bf16 %v1292_v40, %v1291_v28  ;;  %2257 = vmatprep.subr.bf16.mxu1 %v2256_v39  ;;  %v1363_v39 = vld [vmem:[%s3196_s7 + $0x2a0] sm:$0xff]  ;;  %v1364_v28 = vld [vmem:[%s3196_s7 + $0x2a8] sm:$0xff] }
 0x360   :  { %2265 = vmatprep.subr.bf16.mxu0 %v2264_v41  ;;  %v1341_v41 = vld [vmem:[%s3196_s7 + $0x1f0] sm:$0xff] }
 0x361   :  { %v2292_v43 = vpack.c.bf16 %v1342_v42, %v1341_v41  ;;  %2259 = vmatpush3.bf16.msra.mxu1 %v2258_v47 }
 0x362   :  { %1698 = vmatmul.mubr.msk.f32.vlgmr.msra.gmra.mrb[4].mxu0 %vm111_vm1, %v786_v51  ;;  %v2262_v51 = vpack.c.bf16 %v1294_v11, %v1293_v50 }
 0x363   :  { %1699 = vmatprep.mubr.msk.f32.mxu0 %vm112_vm2, %v795_v56  ;;  %2267 = vmatpush3.bf16.msra.mxu0 %v2266_v48  ;;  %v1310_v48 = vld [vmem:[%s3196_s7 + $0xf8] sm:$0xff]  ;;  %v2296_v56 = vpack.c.bf16 %v1360_v3, %v1359_v52  ;;  %v1348_v52 = vld [vmem:[%s3196_s7 + $0x228] sm:$0xff]  ;;  %v1365_v3 = vld [vmem:[%s3196_s7 + $0x2b0] sm:$0xff] }
 0x364   :  { %2269 = vmatprep.subr.bf16.mxu0 %v2268_v49  ;;  %v2260_v49 = vpack.c.bf16 %v1310_v48, %v1309_v46  ;;  %v2304_v48 = vpack.c.bf16 %v1364_v28, %v1363_v39 }
 0x366   :  { %1700 = vmatmul.mubr.msk.f32.gmra.mrb[6].mxu0 %vm112_vm2, %v794_v0  ;;  %2261 = vmatprep.subr.bf16.mxu1 %v2260_v49 }
 0x367   :  { %2271 = vmatpush3.bf16.msra.mxu0 %v2270_v58  ;;  %2263 = vmatpush3.bf16.msra.mxu1 %v2262_v51  ;;  %v2468_v58 = vmov 0   ;;  %v1347_v51 = vld [vmem:[%s3196_s7 + $0x220] sm:$0xff] }
 0x368   :  { %2273 = vmatprep.subr.bf16.mxu0 %v2272_v59  ;;  %2297 = vmatprep.subr.bf16.mxu1 %v2296_v56  ;;  %v992_v59 = vld [vmem:[%s3195_s6] sm:$0x3]  ;;  %v1366_v56 = vld [vmem:[%s3196_s7 + $0x2b8] sm:$0xff] }
 0x369   :  { %2364 = vset.pattern.permute.xlu0 %v2468_v58  ;;  %v997_v60 = vrot.slane %v992_v59, %v2697_v53  ;;  %v1001_v61 = vrot.slane %v992_v59, %v2703_v55  ;;  %v2306_v58 = vpack.c.bf16 %v1348_v52, %v1347_v51  ;;  %v2308_v59 = vpack.c.bf16 %v1366_v56, %v1365_v3 }
 0x36b   :  { %2275 = vmatpush3.bf16.msra.mxu0 %v2274_v1 }
 0x36c   :  { %2277 = vmatprep.subr.bf16.mxu0 %v2276_v9 }
 0x36f   :  { %2279 = vmatpush3.bf16.msra.mxu0 %v2278_v14 }
 0x370   :  { %2281 = vmatprep.subr.bf16.mxu0 %v2280_v15 }
 0x373   :  { %2283 = vmatpush3.bf16.msra.mxu0 %v2282_v23  ;;  %v1345_v23 = vld [vmem:[%s3196_s7 + $0x210] sm:$0xff] }
 0x374   :  { %2285 = vmatprep.subr.bf16.mxu0 %v2284_v24  ;;  %v1346_v24 = vld [vmem:[%s3196_s7 + $0x218] sm:$0xff] }
 0x375   :  { %v2302_v5 = vpack.c.bf16 %v1346_v24, %v1345_v23  ;;  %v1374_v23 = vld [vmem:[%s3196_s7 + $0x2f8] sm:$0xff]  ;;  %v1638_v24 = vld [vmem:[#allocation2] sm:$0x1] }
 0x377   :  { %2287 = vmatpush3.bf16.msra.mxu0 %v2286_v27 }
 0x378   :  { %2289 = vmatprep.subr.bf16.mxu0 %v2288_v37 }
 0x37b   :  { %2291 = vmatpush3.bf16.msra.mxu0 %v2290_v7 }
 0x37c   :  { %2293 = vmatprep.subr.bf16.mxu0 %v2292_v43 }
 0x37f   :  { %2295 = vmatpush3.bf16.msra.mxu0 %v2294_v36 }
 0x435   :  { %v1224_v0 = vpop.f32.mrb[4].mxu0 }
 0x436   :  { %v2332_v12 = vadd.f32 %v1224_v0, %v997_v60  ;;  %v1226_v57 = vpop.f32.mrb[5].mxu0  ;;  %v1368_v0 = vld [vmem:[%s3196_s7 + $0x2c8] sm:$0xff] }
 0x437   :  { %v2333_v1 = vadd.f32 %v1226_v57, %v1001_v61  ;;  %v2312_v57 = vpack.c.bf16 %v1368_v0, %v1367_v32 }
 0x438   :  { %v1235_v9 = vadd.f32 %v2332_v12, %v2707_v62  ;;  %v1344_v62 = vld [vmem:[%s3196_s7 + $0x208] sm:$0xff] }
 0x439   :  { %v1236_v10 = vadd.f32 %v2333_v1, %v2709_v63  ;;  %v1230_v2 = vpop.f32.mrb[6].mxu0  ;;  %v1361_v63 = vld [vmem:[%s3196_s7 + $0x290] sm:$0xff]  ;;  %v2298_v37 = vpack.c.bf16 %v1344_v62, %v1343_v18  ;;  %v1351_v1 = vld [vmem:[%s3196_s7 + $0x240] sm:$0xff]  ;;  %v1372_v18 = vld [vmem:[%s3196_s7 + $0x2e8] sm:$0xff] }
 0x43a   :  { %v1239_v14 = vmax.f32 %v1235_v9, 0.0  ;;  %v2334_v15 = vadd.f32 %v1230_v2, %v997_v60  ;;  %v1232_v55 = vpop.f32.mrb[7].mxu0  ;;  %v2300_v4 = vpack.c.bf16 %v1362_v22, %v1361_v63  ;;  %v1349_v60 = vld [vmem:[%s3196_s7 + $0x230] sm:$0xff]  ;;  %v1352_v9 = vld [vmem:[%s3196_s7 + $0x248] sm:$0xff]  ;;  %v1370_v2 = vld [vmem:[%s3196_s7 + $0x2d8] sm:$0xff] }
 0x43b   :  { %v1240_v20 = vmax.f32 %v1236_v10, 0.0  ;;  %v2335_v21 = vadd.f32 %v1232_v55, %v1001_v61  ;;  %v1350_v61 = vld [vmem:[%s3196_s7 + $0x238] sm:$0xff]  ;;  %v1369_v10 = vld [vmem:[%s3196_s7 + $0x2d0] sm:$0xff]  ;;  %v1371_v55 = vld [vmem:[%s3196_s7 + $0x2e0] sm:$0xff] }
 0x43c   :  { %v1237_v25 = vadd.f32 %v2334_v15, %v2713_v17  ;;  %v1614_v26 = vmul.f32 %v1610_v13, %v1239_v14  ;;  %v1247_v27 = vrot.slane %v1239_v14, 7  ;;  %v1613_v17 = vld [vmem:[%s3198_s9 + $0x18] sm:$0xff]  ;;  %v1263_v7 = vrot.slane %v1239_v14, 1  ;;  %v1373_v22 = vld [vmem:[%s3196_s7 + $0x2f0] sm:$0xff] }
 0x43d   :  { %v1238_v29 = vadd.f32 %v2335_v21, %v2715_v19  ;;  %1521 = vmatprep.mubr.f32.mxu0 %v1240_v20  ;;  %v1248_v30 = vrot.slane %v1240_v20, 7  ;;  %v1615_v33 = vmul.f32 %v1611_v54, %v1240_v20  ;;  %v1266_v45 = vrot.slane %v1240_v20, 1  ;;  %v1354_v15 = vld [vmem:[%s3196_s7 + $0x258] sm:$0xff]  ;;  %v1355_v20 = vld [vmem:[%s3196_s7 + $0x260] sm:$0xff]  ;;  %v1356_v21 = vld [vmem:[%s3196_s7 + $0x268] sm:$0xff] }
 0x43e   :  { %v3042_v35 = vmax.f32 %v1237_v25, 0.0  ;;  %1522 = vmatmul.mubr.f32.vlgmr.msra.gmra.mrb[8].mxu0 %v1239_v14  ;;  %v1257_v47 = vsel %vm119_vm3, 0.0, %v1247_v27  ;;  %v2310_v12 = vpack.c.bf16 %v1350_v61, %v1349_v60  ;;  %v2314_v13 = vpack.c.bf16 %v1352_v9, %v1351_v1  ;;  %v1353_v14 = vld [vmem:[%s3196_s7 + $0x250] sm:$0xff] }
 0x43f   :  { %v3047_v38 = vmax.f32 %v1238_v29, 0.0  ;;  %v1258_v19 = vsel %vm119_vm3, 0.0, %v1248_v30  ;;  %v1618_v8 = vadd.f32 %v1615_v33, %v1614_v26  ;;  %v2316_v54 = vpack.c.bf16 %v1370_v2, %v1369_v10  ;;  %v1358_v29 = vld [vmem:[%s3196_s7 + $0x278] sm:$0xff] }
 0x440   :  { %v1264_v40 = vrot.slane %v3042_v35, 1  ;;  %1702 = vmatprep.mubr.msk.f32.mxu1 %vm101_vm4, %v1258_v19  ;;  %v1616_v41 = vmul.f32 %v1612_v34, %v3042_v35  ;;  %v1249_v42 = vrot.slane %v3042_v35, 7  ;;  %v2318_v62 = vpack.c.bf16 %v1354_v15, %v1353_v14 }
 0x441   :  { %1619 = vadd.xlane.f32.xlu0 %v1618_v8  ;;  %1703 = vmatmul.mubr.msk.f32.vlgmr.msra.gmra.mrb[4].mxu1 %vm101_vm4, %v1257_v47  ;;  %v1251_v43 = vrot.slane %v3047_v38, 7  ;;  %v1617_v44 = vmul.f32 %v1613_v17, %v3047_v38  ;;  %v1267_v36 = vrot.slane %v3047_v38, 1  ;;  %v2320_v63 = vpack.c.bf16 %v1372_v18, %v1371_v55 }
 0x442   :  { %1526 = vmatprep.mubr.f32.mxu0 %v3047_v38  ;;  %2299 = vmatpush3.bf16.msra.mxu1 %v2298_v37  ;;  %v1250_v46 = vsel %vm119_vm3, %v1247_v27, %v1249_v42  ;;  %v1265_v49 = vsel %vm132_vm0, %v1263_v7, %v1264_v40  ;;  %v2322_v25 = vpack.c.bf16 %v1356_v21, %v1355_v20  ;;  %v1357_v27 = vld [vmem:[%s3196_s7 + $0x270] sm:$0xff]  ;;  %v1273_v34 = vsel %vm132_vm0, %v1264_v40, 0.0  ;;  %s2469_s7 = smov [#allocation9]  }
 0x443   :  { %1527 = vmatmul.mubr.f32.gmra.mrb[10].mxu0 %v3042_v35  ;;  %v1252_v31 = vsel %vm119_vm3, %v1248_v30, %v1251_v43  ;;  %2301 = vmatprep.subr.bf16.mxu1 %v2300_v4  ;;  %v1621_v50 = vadd.f32 %v1617_v44, %v1616_v41  ;;  %v1268_v11 = vsel %vm132_vm0, %v1266_v45, %v1267_v36  ;;  %v1274_v33 = vsel %vm132_vm0, %v1267_v36, 0.0  ;;  %s1669_s19 = sshll.u32 %s2469_s7, 4  ;;  %s1670_s19 = int_to_ptr.vmem [resolvable:$true] %s1669_s19 }
 0x444   :  { %1704 = vmatprep.mubr.msk.f32.mxu1 %vm102_vm5, %v1252_v31  ;;  %v2324_v26 = vpack.c.bf16 %v1374_v23, %v1373_v22  ;;  %v2326_v30 = vpack.c.bf16 %v1358_v29, %v1357_v27  ;;  %s2409_s2 = scalar_lea.vmem %s1670_s19, 16  ;;  %s2413_s0 = scalar_lea.vmem %s1670_s19, 32 }
 0x445   :  { %1622 = vadd.xlane.f32.xlu1 %v1621_v50  ;;  %1705 = vmatmul.mubr.msk.f32.gmra.mrb[6].mxu1 %vm102_vm5, %v1250_v46  ;;  %p2410_p2 = scmp.ne.s32.totalorder %s1670_s19, %s2409_s2  ;;  %p2414_p3 = scmp.lt.s32.totalorder %s1670_s19, %s1670_s19 }
 0x446   :  { %2303 = vmatpush3.bf16.msra.mxu1 %v2302_v5  ;;  %1706 = vmatprep.mubr.msk.f32.mxu1 %vm111_vm1, %v1268_v11  ;;  %p2415_p4 = scmp.lt.s32.totalorder %s2413_s0, %s2409_s2 }
 0x447   :  { %2305 = vmatprep.subr.bf16.mxu1 %v2304_v48 }
 0x448   :  { %p2416_p5 = por %p2415_p4, %p2414_p3 }
 0x44a   :  { %2307 = vmatpush3.bf16.msra.mxu1 %v2306_v58  ;;  %p2417_p6 = pnand %p2416_p5, %p2410_p2 }
 0x44b   :  { %2309 = vmatprep.subr.bf16.mxu1 %v2308_v59 }
 0x44e   :  { %2311 = vmatpush3.bf16.msra.mxu1 %v2310_v12 }
 0x44f   :  { %2313 = vmatprep.subr.bf16.mxu1 %v2312_v57 }
 0x452   :  { %2315 = vmatpush3.bf16.msra.mxu1 %v2314_v13 }
 0x453   :  { %2317 = vmatprep.subr.bf16.mxu1 %v2316_v54 }
 0x456   :  { %2319 = vmatpush3.bf16.msra.mxu1 %v2318_v62 }
 0x457   :  { %2321 = vmatprep.subr.bf16.mxu1 %v2320_v63  ;;  %1641 = vperm.xlu0 %2364, %v1638_v24  }
 0x45a   :  { %2323 = vmatpush3.bf16.msra.mxu1 %v2322_v25 }
 0x45b   :  { %2325 = vmatprep.subr.bf16.mxu1 %v2324_v26 }
 0x45e   :  { %2327 = vmatpush3.bf16.msra.mxu1 %v2326_v30 }
 0x461   :  { %1707 = vmatmul.mubr.msk.f32.vlgmr.msra.gmra.mrb[8].mxu1 %vm111_vm1, %v1265_v49 }
 0x462   :  { %1708 = vmatprep.mubr.msk.f32.mxu1 %vm112_vm2, %v1274_v33 }
 0x465   :  { %1709 = vmatmul.mubr.msk.f32.gmra.mrb[10].mxu1 %vm112_vm2, %v1273_v34 }
 0x4ce   :  { %v1620_v37 = vpop.xlane.xlu0 %1619 }
 0x4cf   :  { %v1624_v4 = vrot.slane %v1620_v37, 4 }
 0x4d1   :  { %v1625_v17 = vadd.f32 %v1624_v4, %v1620_v37 }
 0x4d2   :  { %v1623_v5 = vpop.xlane.xlu1 %1622 }
 0x4d3   :  { %v1626_v6 = vrot.slane %v1625_v17, 2  ;;  %v1630_v7 = vrot.slane %v1623_v5, 4 }
 0x4d5   :  { %v1627_v19 = vadd.f32 %v1626_v6, %v1625_v17  ;;  %v1631_v38 = vadd.f32 %v1630_v7, %v1623_v5 }
 0x4d6   :  { %v1642_v47 = vpop.permute.xlu0 %1641 }
 0x4d7   :  { %v1632_v8 = vrot.slane %v1631_v38, 2  ;;  %v1628_v39 = vrot.slane %v1627_v19, 1  ;;  %v1647_v35 = vrot.slane %v1642_v47, %v2697_v53 }
 0x4d9   :  { %v1633_v28 = vadd.f32 %v1632_v8, %v1631_v38  ;;  %v1629_v40 = vadd.f32 %v1628_v39, %v1627_v19 }
 0x4db   :  { %v1634_v41 = vrot.slane %v1633_v28, 1 }
 0x4dd   :  { %v1635_v42 = vadd.f32 %v1634_v41, %v1633_v28 }
 0x4df   :  { %v1637_v16 = vsel %vm1636_vm9, %v1629_v40, %v1635_v42 }
 0x4e0   :  { %v1648_v43 = vadd.f32 %v1647_v35, %v1637_v16 }
 0x4e2   :  { %1650 = vst.msk [vmem:[#allocation9] sm:$0x1] %vm1649_vm10, %v1648_v43 }
 0x4e3   :  { %2420 = shalt.err (!%p2417_p6)
}
 0x4e4   :  { %s2421_s21 = scalar_lea.hbm %s3201_s12, 16 }
 0x4e5   :  { %p2422_p7 = scmp.ne.s32.totalorder %s3201_s12, %s2421_s21  ;;  %p2425_p8 = scmp.lt.u32.totalorder %s2421_s21, %s3201_s12 }
 0x4e7   :  { %p2427_p9 = pnand %p2425_p8, %p2422_p7 }
 0x4e9   :  { %2430 = shalt.err (!%p2427_p9)
}
 0x4ea   :  { %1672 = dma.vmem_to_hbm [thread:$0]  %s1670_s19, 16, %s3201_s12, [#allocation10]   ;;  %v1701_v46 = vld [vmem:[%s3197_s8] ss:$0 sm:$0xff]  ;;  %vm1607_vm11 = vcmask 64512  }
 0x4eb   :  { %s2470_s12 = smov [#allocation8]  }
 0x4ec   :  { %s1656_s8 = sshll.u32 %s2470_s12, 4  ;;  %s1657_s8 = int_to_ptr.vmem [resolvable:$true] %s1656_s8 }
 0x4ed   :  { %s2431_s24 = scalar_lea.vmem %s1657_s8, 256  ;;  %p2436_p11 = scmp.lt.s32.totalorder %s1657_s8, %s1657_s8 }
 0x4ee   :  { %p2432_p10 = scmp.ne.s32.totalorder %s1657_s8, %s2431_s24  ;;  %p2437_p12 = scmp.lt.s32.totalorder %s2431_s24, %s2431_s24 }
 0x4f0   :  { %p2438_p13 = por %p2437_p12, %p2436_p11 }
 0x4f2   :  { %p2439_p0 = pnand %p2438_p13, %p2432_p10 }
 0x511   :  { %v1780_v53 = vpop.f32.mrb[8].mxu0 }
 0x512   :  { %v1781_v44 = vpop.f32.mrb[9].mxu0 }
 0x513   :  { %v1782_v45 = vadd.f32 %v1781_v44, %v1780_v53 }
 0x514   :  { %v1742_v36 = vpop.f32.mrb[4].mxu1 }
 0x515   :  { %v1743_v48 = vpop.f32.mrb[5].mxu1 }
 0x516   :  { %v1744_v49 = vadd.f32 %v1743_v48, %v1742_v36  ;;  %v1783_v31 = vpop.f32.mrb[10].mxu0 }
 0x517   :  { %v1784_v50 = vpop.f32.mrb[11].mxu0 }
 0x518   :  { %v1449_v11 = vadd.f32 %v1744_v49, %v1701_v46  ;;  %v1785_v51 = vadd.f32 %v1784_v50, %v1783_v31  ;;  %v1745_v52 = vpop.f32.mrb[6].mxu1 }
 0x519   :  { %v1746_v3 = vpop.f32.mrb[7].mxu1 }
 0x51a   :  { %v1747_v56 = vadd.f32 %v1746_v3, %v1745_v52  ;;  %v1524_v58 = vadd.f32 %v1782_v45, %v1449_v11 }
 0x51c   :  { %v1454_v59 = vadd.f32 %v1747_v56, %v1701_v46 }
 0x51e   :  { %v1529_v60 = vadd.f32 %v1785_v51, %v1454_v59 }
 0x534   :  { %v1818_v61 = vpop.f32.mrb[8].mxu1 }
 0x535   :  { %v1819_v32 = vpop.f32.mrb[9].mxu1 }
 0x536   :  { %v1820_v0 = vadd.f32 %v1819_v32, %v1818_v61 }
 0x538   :  { %v1599_v12 = vadd.f32 %v1820_v0, %v1524_v58  ;;  %v1821_v57 = vpop.f32.mrb[10].mxu1 }
 0x539   :  { %v1822_v1 = vpop.f32.mrb[11].mxu1 }
 0x53a   :  { %1608 = vst.msk [vmem:[#allocation8] sm:$0xff] %vm1607_vm11, %v1599_v12  ;;  %v1823_v9 = vadd.f32 %v1822_v1, %v1821_v57 }
 0x53c   :  { %v1604_v10 = vadd.f32 %v1823_v9, %v1529_v60 }
 0x53e   :  { %1609 = vst.msk [vmem:[#allocation8 + $0x8] sm:$0xff] %vm1607_vm11, %v1604_v10 }
 0x53f   :  { %2442 = shalt.err (!%p2439_p0)
}
 0x540   :  { %s2443_s6 = scalar_lea.hbm %s3200_s11, 256 }
 0x541   :  { %p2444_p1 = scmp.ne.s32.totalorder %s3200_s11, %s2443_s6  ;;  %p2447_p2 = scmp.lt.u32.totalorder %s2443_s6, %s3200_s11 }
 0x543   :  { %p2449_p3 = pnand %p2447_p2, %p2444_p1 }
 0x545   :  { %2452 = shalt.err (!%p2449_p3)
}
 0x546   :  { %s2471_s15 = smov 128   ;;  %s2472_s16 = smov 8  }
 0x547   :  { %1662 = dma.vmem_to_hbm [thread:$0]  %s1657_s8, 256, %s3200_s11, [#allocation5], %s2471_s15, %s2471_s15, %s2472_s16  }
 0x548   :  { %2457 = dma.done.wait [#allocation5], 256  }
 0x549   :  { %2458 = vsyncadd [#allocation5], 4294967040 }
 0x54a   :  { %2459 = dma.done.wait [#allocation10], 16  }
 0x54b   :  { %2460 = vsyncadd [#allocation10], 4294967280 }
 0x54c   :  { %1679 = vsyncpa [#allocation4], 1 }
 0x54d   :  { %1680 = vsyncpa [#allocation7], 1 }
 0x54e   :  { %1681 = vsyncpa [#allocation5], 1 }
 0x54f   :  { %1682 = vsyncpa [#allocation10], 1 }

</bundles_post_ra>
